<compile_context>
chip_gen: v7x
topology: tpu7x:2x2x1
jax: 0.10.0
libtpu: 0.0.40
codegen_flags: <defaults>
</compile_context>

<pallas_src>
import functools

import jax
import jax.numpy as jnp
import numpy as np
from jax.experimental import pallas as pl
from jax.experimental.pallas import tpu as pltpu

EPS = 1e-5     # nn.BatchNorm2d default eps
LANES = 128


def _round_up(x, m):
    return (x + m - 1) // m * m


# ---------------------------------------------------------------------------
# Kernel 1: fused 3x3 conv (pad=1, stride=1) + BN partial-statistics epilogue
# ---------------------------------------------------------------------------
def _conv3x3_stats_kernel(x_ref, w_ref, y_ref, s_ref, acc_ref, *, H, W):
    # x_ref : (1, H+2, W+2, Cin)  f32   spatially padded image (one batch item)
    # w_ref : (9, Cin, Cout)      bf16  tap-major (kh, kw) weights
    # y_ref : (1, H, W, Cout)     f32   conv output
    # s_ref : (1, 2, Cout)        f32   per-image [sum, sum_of_squares]
    # acc_ref: (H*W, Cout)        f32   VMEM accumulator scratch
    acc_ref[...] = jnp.zeros_like(acc_ref)
    for kh in range(3):
        for kw in range(3):
            win = x_ref[0, pl.ds(kh, H), pl.ds(kw, W), :]        # (H, W, Cin)
            win = win.reshape(H * W, win.shape[-1]).astype(jnp.bfloat16)
            acc_ref[...] += jnp.dot(win, w_ref[kh * 3 + kw],
                                    preferred_element_type=jnp.float32)
    y = acc_ref[...]                                             # (H*W, Cout)
    y_ref[...] = y.reshape(y_ref.shape)
    s_ref[...] = jnp.concatenate(
        [jnp.sum(y, axis=0, keepdims=True),
         jnp.sum(y * y, axis=0, keepdims=True)], axis=0).reshape(s_ref.shape)


def conv3x3_with_stats(x_pad, w9):
    """x_pad: (N, H+2, W+2, Cin) f32; w9: (9, Cin, Cout) bf16.

    Returns (y, stats): y (N, H, W, Cout) f32, stats (N, 2, Cout) f32."""
    N, Hp, Wp, Cin = x_pad.shape
    H, W = Hp - 2, Wp - 2
    Cout = w9.shape[-1]
    kernel = functools.partial(_conv3x3_stats_kernel, H=H, W=W)
    return pl.pallas_call(
        kernel,
        out_shape=(jax.ShapeDtypeStruct((N, H, W, Cout), jnp.float32),
                   jax.ShapeDtypeStruct((N, 2, Cout), jnp.float32)),
        grid_spec=pltpu.PrefetchScalarGridSpec(
            num_scalar_prefetch=0,
            grid=(N,),
            in_specs=[
                pl.BlockSpec((1, Hp, Wp, Cin), lambda n: (n, 0, 0, 0)),
                pl.BlockSpec((9, Cin, Cout), lambda n: (0, 0, 0)),
            ],
            out_specs=[
                pl.BlockSpec((1, H, W, Cout), lambda n: (n, 0, 0, 0)),
                pl.BlockSpec((1, 2, Cout), lambda n: (n, 0, 0)),
            ],
            scratch_shapes=[pltpu.VMEM((H * W, Cout), jnp.float32)],
        ),
        compiler_params=pltpu.CompilerParams(
            dimension_semantics=("parallel",)),   # per-image, megacore-friendly
    )(x_pad, w9)


# ---------------------------------------------------------------------------
# Kernel 2: fused (BN+Mask folded) affine -> (+residual) -> ReLU, row-tiled
# ---------------------------------------------------------------------------
def _affine_relu_kernel(y_ref, sc_ref, sh_ref, o_ref):
    o_ref[...] = jnp.maximum(
        y_ref[...] * sc_ref[...] + sh_ref[...], 0.0).astype(o_ref.dtype)


def _affine_res_relu_kernel(y_ref, sc_ref, sh_ref, r_ref, o_ref):
    o_ref[...] = jnp.maximum(
        y_ref[...] * sc_ref[...] + sh_ref[...] + r_ref[...], 0.0
    ).astype(o_ref.dtype)


def affine_relu(y, scale, shift, res=None, *, out_dtype=jnp.float32, tm=256):
    """y: (M, C) f32; scale/shift: (1, C) f32; res: optional (M, C) f32."""
    M, C = y.shape
    Mp = pl.cdiv(M, tm) * tm
    if Mp != M:                               # pad rows to the tile size
        y = jnp.pad(y, ((0, Mp - M), (0, 0)))
        if res is not None:
            res = jnp.pad(res, ((0, Mp - M), (0, 0)))
    tile = pl.BlockSpec((tm, C), lambda i: (i, 0))
    row = pl.BlockSpec((1, C), lambda i: (0, 0))
    if res is None:
        kernel = _affine_relu_kernel
        operands, in_specs = (y, scale, shift), [tile, row, row]
    else:
        kernel = _affine_res_relu_kernel
        operands, in_specs = (y, scale, shift, res), [tile, row, row, tile]
    out = pl.pallas_call(
        kernel,
        out_shape=jax.ShapeDtypeStruct((Mp, C), out_dtype),
        grid_spec=pltpu.PrefetchScalarGridSpec(
            num_scalar_prefetch=0,
            grid=(Mp // tm,),
            in_specs=in_specs,
            out_specs=tile,
        ),
        compiler_params=pltpu.CompilerParams(
            dimension_semantics=("parallel",)),
    )(*operands)
    return out if Mp == M else out[:M]


# ---------------------------------------------------------------------------
# Plain-JAX glue: padding, weight layout, BN+Mask folding
# ---------------------------------------------------------------------------
def _pad_last(a, target):
    pad = target - a.shape[-1]
    if pad == 0:
        return a
    cfg = [(0, 0)] * (a.ndim - 1) + [(0, pad)]
    return jnp.pad(a, cfg)


def _weights_to_taps(w_oihw, cin_p, cout_p):
    """(Cout, Cin, 3, 3) -> (9, Cin_p, Cout_p) bf16, tap-major (kh, kw)."""
    cout, cin = w_oihw.shape[:2]
    w = jnp.transpose(w_oihw, (2, 3, 1, 0))               # (3, 3, Cin, Cout)
    w = jnp.pad(w, ((0, 0), (0, 0), (0, cin_p - cin), (0, cout_p - cout)))
    return w.reshape(9, cin_p, cout_p).astype(jnp.bfloat16)


def _bn_mask_scale_shift(stats, count, gamma, beta, mask):
    """Fold BatchNorm (batch stats, biased var) + Mask into a scale/shift.

    stats: (2, C) [sum, sum_sq]; gamma/beta/mask: (1, C)."""
    mean = stats[0] / count
    var = jnp.maximum(stats[1] / count - mean * mean, 0.0)
    inv_std = jax.lax.rsqrt(var + EPS)
    scale = gamma * mask * inv_std
    shift = (beta - gamma * mean * inv_std) * mask
    return scale.astype(jnp.float32), shift.astype(jnp.float32)


# ---------------------------------------------------------------------------
# BasicBlock forward (stride=1, downsample=None)
# ---------------------------------------------------------------------------
def basic_block_forward(x_nchw, params, *, tm=256):
    x = jnp.transpose(x_nchw, (0, 2, 3, 1)).astype(jnp.float32)   # NHWC
    N, H, W, Cin = x.shape
    planes = params["w1"].shape[0]
    assert Cin == planes, "identity residual requires inplanes == planes"
    Cp = _round_up(max(Cin, planes), LANES)
    M = N * H * W

    x_c = _pad_last(x, Cp)                      # (N, H, W, Cp) f32, lane-dense
    identity_rows = x_c.reshape(M, Cp)

    w1 = _weights_to_taps(params["w1"], Cp, Cp)
    w2 = _weights_to_taps(params["w2"], Cp, Cp)
    g1, b1, m1 = (_pad_last(params[k], Cp) for k in ("g1", "b1", "m1"))
    g2, b2, m2 = (_pad_last(params[k], Cp) for k in ("g2", "b2", "m2"))

    # conv1 (+BN stats epilogue) -> folded BN1*Mask1 affine -> ReLU
    x_sp = jnp.pad(x_c, ((0, 0), (1, 1), (1, 1), (0, 0)))
    y1, s1 = conv3x3_with_stats(x_sp, w1)
    sc1, sh1 = _bn_mask_scale_shift(s1.sum(axis=0), M, g1, b1, m1)
    a1 = affine_relu(y1.reshape(M, Cp), sc1, sh1, tm=tm)

    # conv2 (+BN stats epilogue) -> folded BN2*Mask2 affine -> +identity -> ReLU
    a1_sp = jnp.pad(a1.reshape(N, H, W, Cp), ((0, 0), (1, 1), (1, 1), (0, 0)))
    y2, s2 = conv3x3_with_stats(a1_sp, w2)
    sc2, sh2 = _bn_mask_scale_shift(s2.sum(axis=0), M, g2, b2, m2)
    out = affine_relu(y2.reshape(M, Cp), sc2, sh2, res=identity_rows, tm=tm)

    out = out.reshape(N, H, W, Cp)[..., :planes]
    return jnp.transpose(out, (0, 3, 1, 2))                       # NCHW


# ---------------------------------------------------------------------------
# Pure-JAX f32 reference (for correctness check)
# ---------------------------------------------------------------------------
def _ref_conv(x, w):
    return jax.lax.conv_general_dilated(
        x, w, (1, 1), ((1, 1), (1, 1)),
        dimension_numbers=("NCHW", "OIHW", "NCHW"),
        precision=jax.lax.Precision.HIGHEST)


def _ref_bn_mask(x, g, b, m):
    mean = x.mean(axis=(0, 2, 3), keepdims=True)
    var = ((x - mean) ** 2).mean(axis=(0, 2, 3), keepdims=True)
    y = (x - mean) * jax.lax.rsqrt(var + EPS)
    y = y * g[None, :, None, None] + b[None, :, None, None]
    return y * m[None, :, None, None]


def basic_block_reference(x, p):
    out = _ref_bn_mask(_ref_conv(x, p["w1"]), p["g1"][0], p["b1"][0], p["m1"][0])
    out = jnp.maximum(out, 0.0)
    out = _ref_bn_mask(_ref_conv(out, p["w2"]), p["g2"][0], p["b2"][0], p["m2"][0])
    out = out + x
    return jnp.maximum(out, 0.0)


# ---------------------------------------------------------------------------
if __name__ == "__main__":
    key = jax.random.PRNGKey(0)
    N, C, H, W = 2, 4, 16, 16          # inplanes = planes = 4, stride = 1
    planes = C
    num_tasks = 4

    ks = jax.random.split(key, 8)
    fan1, fan2 = 9 * C, 9 * planes
    params = {
        "w1": jax.random.normal(ks[0], (planes, C, 3, 3), jnp.float32)
              * jnp.sqrt(2.0 / fan1),
        "w2": jax.random.normal(ks[1], (planes, planes, 3, 3), jnp.float32)
              * jnp.sqrt(2.0 / fan2),
        # BN affine params (PyTorch defaults are ones/zeros; randomized
        # deterministically to exercise the broadcast / folding paths).
        "g1": 1.0 + 0.1 * jax.random.normal(ks[2], (1, planes), jnp.float32),
        "b1": 0.1 * jax.random.normal(ks[3], (1, planes), jnp.float32),
        "g2": 1.0 + 0.1 * jax.random.normal(ks[4], (1, planes), jnp.float32),
        "b2": 0.1 * jax.random.normal(ks[5], (1, planes), jnp.float32),
        # Mask params: per-task per-channel, task 0 selected.
        "m1": jax.random.uniform(ks[6], (num_tasks, planes), jnp.float32,
                                 0.5, 1.5)[0:1],
        "m2": jax.random.uniform(ks[7], (num_tasks, planes), jnp.float32,
                                 0.5, 1.5)[0:1],
    }

    x = jax.random.normal(key, (N, C, H, W), jnp.float32)

    out = jax.block_until_ready(basic_block_forward(x, params, tm=256))
    ref = jax.block_until_ready(basic_block_reference(x, params))

    # Tolerance loosened vs the pure-f32 version: the matmuls run on the bf16
    # MXU path (f32 accumulation); BN statistics / affine / residual are f32.
    np.testing.assert_allclose(np.asarray(out), np.asarray(ref),
                               rtol=5e-2, atol=1e-1)

    print("KERNEL_OK")
</pallas_src>

<mosaic_0001>
module attributes {stable_mosaic.version = 11 : i64} {
  func.func @_conv3x3_stats_kernel(%arg0: i32, %arg1: memref<1x18x18x128xf32, #tpu.memory_space<vmem>>, %arg2: memref<9x128x128xbf16, #tpu.memory_space<vmem>>, %arg3: memref<1x16x16x128xf32, #tpu.memory_space<vmem>>, %arg4: memref<1x2x128xf32, #tpu.memory_space<vmem>>, %arg5: memref<256x128xf32, #tpu.memory_space<vmem>>) attributes {dimension_semantics = [#tpu.dimension_semantics<parallel>], iteration_bounds = array<i64: 2>, scalar_prefetch = 0 : i64, scratch_operands = 1 : i64, tpu.core_type = #tpu.core_type<tc>, window_params = [{transform_indices = @transform_0, window_bounds = array<i64: 1, 18, 18, 128>}, {pipeline_mode = #tpu.pipeline_mode<synchronous>, transform_indices = @transform_1, window_bounds = array<i64: 9, 128, 128>}, {transform_indices = @transform_2, window_bounds = array<i64: 1, 16, 16, 128>}, {transform_indices = @transform_3, window_bounds = array<i64: 1, 2, 128>}]} {
    %cst = arith.constant 0.000000e+00 : f32
    %0 = vector.broadcast %cst : f32 to vector<256x128xf32>
    %c0 = arith.constant 0 : index
    %c0_0 = arith.constant 0 : index
    %1 = vector.load %arg5[%c0, %c0_0] : memref<256x128xf32, #tpu.memory_space<vmem>>, vector<256x128xf32>
    tpu.vector_store %arg5[%c0, %c0_0], %0 {strides = array<i32>} : memref<256x128xf32, #tpu.memory_space<vmem>>, vector<256x128xf32>,
    %c0_1 = arith.constant 0 : index
    %c0_2 = arith.constant 0 : index
    %c0_3 = arith.constant 0 : index
    %c0_4 = arith.constant 0 : index
    %2 = vector.load %arg1[%c0_1, %c0_2, %c0_3, %c0_4] : memref<1x18x18x128xf32, #tpu.memory_space<vmem>>, vector<1x16x16x128xf32>
    %3 = vector.shape_cast %2 : vector<1x16x16x128xf32> to vector<16x16x128xf32>
    %4 = vector.shape_cast %3 : vector<16x16x128xf32> to vector<256x128xf32>
    %5 = arith.truncf %4 : vector<256x128xf32> to vector<256x128xbf16>
    %c0_5 = arith.constant 0 : index
    %c0_6 = arith.constant 0 : index
    %6 = vector.load %arg5[%c0_5, %c0_6] : memref<256x128xf32, #tpu.memory_space<vmem>>, vector<256x128xf32>
    %c0_7 = arith.constant 0 : index
    %c0_8 = arith.constant 0 : index
    %c0_9 = arith.constant 0 : index
    %7 = vector.load %arg2[%c0_7, %c0_8, %c0_9] : memref<9x128x128xbf16, #tpu.memory_space<vmem>>, vector<1x128x128xbf16>
    %8 = vector.shape_cast %7 : vector<1x128x128xbf16> to vector<128x128xbf16>
    %cst_10 = arith.constant dense<0.000000e+00> : vector<256x128xf32>
    %9 = tpu.matmul %5, %8, %cst_10 {dimension_numbers = #tpu.dot_dimension_numbers<[1], [0], [0], [1], [0, 0, 1, 1], [], []>} : vector<256x128xbf16>, vector<128x128xbf16>, vector<256x128xf32> -> vector<256x128xf32>
    %10 = arith.addf %6, %9 : vector<256x128xf32>
    %c0_11 = arith.constant 0 : index
    %c0_12 = arith.constant 0 : index
    %11 = vector.load %arg5[%c0_11, %c0_12] : memref<256x128xf32, #tpu.memory_space<vmem>>, vector<256x128xf32>
    tpu.vector_store %arg5[%c0_11, %c0_12], %10 {strides = array<i32>} : memref<256x128xf32, #tpu.memory_space<vmem>>, vector<256x128xf32>,
    %c0_13 = arith.constant 0 : index
    %c0_14 = arith.constant 0 : index
    %c1 = arith.constant 1 : index
    %c0_15 = arith.constant 0 : index
    %12 = vector.load %arg1[%c0_13, %c0_14, %c1, %c0_15] : memref<1x18x18x128xf32, #tpu.memory_space<vmem>>, vector<1x16x16x128xf32>
    %13 = vector.shape_cast %12 : vector<1x16x16x128xf32> to vector<16x16x128xf32>
    %14 = vector.shape_cast %13 : vector<16x16x128xf32> to vector<256x128xf32>
    %15 = arith.truncf %14 : vector<256x128xf32> to vector<256x128xbf16>
    %c0_16 = arith.constant 0 : index
    %c0_17 = arith.constant 0 : index
    %16 = vector.load %arg5[%c0_16, %c0_17] : memref<256x128xf32, #tpu.memory_space<vmem>>, vector<256x128xf32>
    %c1_18 = arith.constant 1 : index
    %c0_19 = arith.constant 0 : index
    %c0_20 = arith.constant 0 : index
    %17 = vector.load %arg2[%c1_18, %c0_19, %c0_20] : memref<9x128x128xbf16, #tpu.memory_space<vmem>>, vector<1x128x128xbf16>
    %18 = vector.shape_cast %17 : vector<1x128x128xbf16> to vector<128x128xbf16>
    %cst_21 = arith.constant dense<0.000000e+00> : vector<256x128xf32>
    %19 = tpu.matmul %15, %18, %cst_21 {dimension_numbers = #tpu.dot_dimension_numbers<[1], [0], [0], [1], [0, 0, 1, 1], [], []>} : vector<256x128xbf16>, vector<128x128xbf16>, vector<256x128xf32> -> vector<256x128xf32>
    %20 = arith.addf %16, %19 : vector<256x128xf32>
    %c0_22 = arith.constant 0 : index
    %c0_23 = arith.constant 0 : index
    %21 = vector.load %arg5[%c0_22, %c0_23] : memref<256x128xf32, #tpu.memory_space<vmem>>, vector<256x128xf32>
    tpu.vector_store %arg5[%c0_22, %c0_23], %20 {strides = array<i32>} : memref<256x128xf32, #tpu.memory_space<vmem>>, vector<256x128xf32>,
    %c0_24 = arith.constant 0 : index
    %c0_25 = arith.constant 0 : index
    %c2 = arith.constant 2 : index
    %c0_26 = arith.constant 0 : index
    %22 = vector.load %arg1[%c0_24, %c0_25, %c2, %c0_26] : memref<1x18x18x128xf32, #tpu.memory_space<vmem>>, vector<1x16x16x128xf32>
    %23 = vector.shape_cast %22 : vector<1x16x16x128xf32> to vector<16x16x128xf32>
    %24 = vector.shape_cast %23 : vector<16x16x128xf32> to vector<256x128xf32>
    %25 = arith.truncf %24 : vector<256x128xf32> to vector<256x128xbf16>
    %c0_27 = arith.constant 0 : index
    %c0_28 = arith.constant 0 : index
    %26 = vector.load %arg5[%c0_27, %c0_28] : memref<256x128xf32, #tpu.memory_space<vmem>>, vector<256x128xf32>
    %c2_29 = arith.constant 2 : index
    %c0_30 = arith.constant 0 : index
    %c0_31 = arith.constant 0 : index
    %27 = vector.load %arg2[%c2_29, %c0_30, %c0_31] : memref<9x128x128xbf16, #tpu.memory_space<vmem>>, vector<1x128x128xbf16>
    %28 = vector.shape_cast %27 : vector<1x128x128xbf16> to vector<128x128xbf16>
    %cst_32 = arith.constant dense<0.000000e+00> : vector<256x128xf32>
    %29 = tpu.matmul %25, %28, %cst_32 {dimension_numbers = #tpu.dot_dimension_numbers<[1], [0], [0], [1], [0, 0, 1, 1], [], []>} : vector<256x128xbf16>, vector<128x128xbf16>, vector<256x128xf32> -> vector<256x128xf32>
    %30 = arith.addf %26, %29 : vector<256x128xf32>
    %c0_33 = arith.constant 0 : index
    %c0_34 = arith.constant 0 : index
    %31 = vector.load %arg5[%c0_33, %c0_34] : memref<256x128xf32, #tpu.memory_space<vmem>>, vector<256x128xf32>
    tpu.vector_store %arg5[%c0_33, %c0_34], %30 {strides = array<i32>} : memref<256x128xf32, #tpu.memory_space<vmem>>, vector<256x128xf32>,
    %c0_35 = arith.constant 0 : index
    %c1_36 = arith.constant 1 : index
    %c0_37 = arith.constant 0 : index
    %c0_38 = arith.constant 0 : index
    %32 = vector.load %arg1[%c0_35, %c1_36, %c0_37, %c0_38] : memref<1x18x18x128xf32, #tpu.memory_space<vmem>>, vector<1x16x16x128xf32>
    %33 = vector.shape_cast %32 : vector<1x16x16x128xf32> to vector<16x16x128xf32>
    %34 = vector.shape_cast %33 : vector<16x16x128xf32> to vector<256x128xf32>
    %35 = arith.truncf %34 : vector<256x128xf32> to vector<256x128xbf16>
    %c0_39 = arith.constant 0 : index
    %c0_40 = arith.constant 0 : index
    %36 = vector.load %arg5[%c0_39, %c0_40] : memref<256x128xf32, #tpu.memory_space<vmem>>, vector<256x128xf32>
    %c3 = arith.constant 3 : index
    %c0_41 = arith.constant 0 : index
    %c0_42 = arith.constant 0 : index
    %37 = vector.load %arg2[%c3, %c0_41, %c0_42] : memref<9x128x128xbf16, #tpu.memory_space<vmem>>, vector<1x128x128xbf16>
    %38 = vector.shape_cast %37 : vector<1x128x128xbf16> to vector<128x128xbf16>
    %cst_43 = arith.constant dense<0.000000e+00> : vector<256x128xf32>
    %39 = tpu.matmul %35, %38, %cst_43 {dimension_numbers = #tpu.dot_dimension_numbers<[1], [0], [0], [1], [0, 0, 1, 1], [], []>} : vector<256x128xbf16>, vector<128x128xbf16>, vector<256x128xf32> -> vector<256x128xf32>
    %40 = arith.addf %36, %39 : vector<256x128xf32>
    %c0_44 = arith.constant 0 : index
    %c0_45 = arith.constant 0 : index
    %41 = vector.load %arg5[%c0_44, %c0_45] : memref<256x128xf32, #tpu.memory_space<vmem>>, vector<256x128xf32>
    tpu.vector_store %arg5[%c0_44, %c0_45], %40 {strides = array<i32>} : memref<256x128xf32, #tpu.memory_space<vmem>>, vector<256x128xf32>,
    %c0_46 = arith.constant 0 : index
    %c1_47 = arith.constant 1 : index
    %c1_48 = arith.constant 1 : index
    %c0_49 = arith.constant 0 : index
    %42 = vector.load %arg1[%c0_46, %c1_47, %c1_48, %c0_49] : memref<1x18x18x128xf32, #tpu.memory_space<vmem>>, vector<1x16x16x128xf32>
    %43 = vector.shape_cast %42 : vector<1x16x16x128xf32> to vector<16x16x128xf32>
    %44 = vector.shape_cast %43 : vector<16x16x128xf32> to vector<256x128xf32>
    %45 = arith.truncf %44 : vector<256x128xf32> to vector<256x128xbf16>
    %c0_50 = arith.constant 0 : index
    %c0_51 = arith.constant 0 : index
    %46 = vector.load %arg5[%c0_50, %c0_51] : memref<256x128xf32, #tpu.memory_space<vmem>>, vector<256x128xf32>
    %c4 = arith.constant 4 : index
    %c0_52 = arith.constant 0 : index
    %c0_53 = arith.constant 0 : index
    %47 = vector.load %arg2[%c4, %c0_52, %c0_53] : memref<9x128x128xbf16, #tpu.memory_space<vmem>>, vector<1x128x128xbf16>
    %48 = vector.shape_cast %47 : vector<1x128x128xbf16> to vector<128x128xbf16>
    %cst_54 = arith.constant dense<0.000000e+00> : vector<256x128xf32>
    %49 = tpu.matmul %45, %48, %cst_54 {dimension_numbers = #tpu.dot_dimension_numbers<[1], [0], [0], [1], [0, 0, 1, 1], [], []>} : vector<256x128xbf16>, vector<128x128xbf16>, vector<256x128xf32> -> vector<256x128xf32>
    %50 = arith.addf %46, %49 : vector<256x128xf32>
    %c0_55 = arith.constant 0 : index
    %c0_56 = arith.constant 0 : index
    %51 = vector.load %arg5[%c0_55, %c0_56] : memref<256x128xf32, #tpu.memory_space<vmem>>, vector<256x128xf32>
    tpu.vector_store %arg5[%c0_55, %c0_56], %50 {strides = array<i32>} : memref<256x128xf32, #tpu.memory_space<vmem>>, vector<256x128xf32>,
    %c0_57 = arith.constant 0 : index
    %c1_58 = arith.constant 1 : index
    %c2_59 = arith.constant 2 : index
    %c0_60 = arith.constant 0 : index
    %52 = vector.load %arg1[%c0_57, %c1_58, %c2_59, %c0_60] : memref<1x18x18x128xf32, #tpu.memory_space<vmem>>, vector<1x16x16x128xf32>
    %53 = vector.shape_cast %52 : vector<1x16x16x128xf32> to vector<16x16x128xf32>
    %54 = vector.shape_cast %53 : vector<16x16x128xf32> to vector<256x128xf32>
    %55 = arith.truncf %54 : vector<256x128xf32> to vector<256x128xbf16>
    %c0_61 = arith.constant 0 : index
    %c0_62 = arith.constant 0 : index
    %56 = vector.load %arg5[%c0_61, %c0_62] : memref<256x128xf32, #tpu.memory_space<vmem>>, vector<256x128xf32>
    %c5 = arith.constant 5 : index
    %c0_63 = arith.constant 0 : index
    %c0_64 = arith.constant 0 : index
    %57 = vector.load %arg2[%c5, %c0_63, %c0_64] : memref<9x128x128xbf16, #tpu.memory_space<vmem>>, vector<1x128x128xbf16>
    %58 = vector.shape_cast %57 : vector<1x128x128xbf16> to vector<128x128xbf16>
    %cst_65 = arith.constant dense<0.000000e+00> : vector<256x128xf32>
    %59 = tpu.matmul %55, %58, %cst_65 {dimension_numbers = #tpu.dot_dimension_numbers<[1], [0], [0], [1], [0, 0, 1, 1], [], []>} : vector<256x128xbf16>, vector<128x128xbf16>, vector<256x128xf32> -> vector<256x128xf32>
    %60 = arith.addf %56, %59 : vector<256x128xf32>
    %c0_66 = arith.constant 0 : index
    %c0_67 = arith.constant 0 : index
    %61 = vector.load %arg5[%c0_66, %c0_67] : memref<256x128xf32, #tpu.memory_space<vmem>>, vector<256x128xf32>
    tpu.vector_store %arg5[%c0_66, %c0_67], %60 {strides = array<i32>} : memref<256x128xf32, #tpu.memory_space<vmem>>, vector<256x128xf32>,
    %c0_68 = arith.constant 0 : index
    %c2_69 = arith.constant 2 : index
    %c0_70 = arith.constant 0 : index
    %c0_71 = arith.constant 0 : index
    %62 = vector.load %arg1[%c0_68, %c2_69, %c0_70, %c0_71] : memref<1x18x18x128xf32, #tpu.memory_space<vmem>>, vector<1x16x16x128xf32>
    %63 = vector.shape_cast %62 : vector<1x16x16x128xf32> to vector<16x16x128xf32>
    %64 = vector.shape_cast %63 : vector<16x16x128xf32> to vector<256x128xf32>
    %65 = arith.truncf %64 : vector<256x128xf32> to vector<256x128xbf16>
    %c0_72 = arith.constant 0 : index
    %c0_73 = arith.constant 0 : index
    %66 = vector.load %arg5[%c0_72, %c0_73] : memref<256x128xf32, #tpu.memory_space<vmem>>, vector<256x128xf32>
    %c6 = arith.constant 6 : index
    %c0_74 = arith.constant 0 : index
    %c0_75 = arith.constant 0 : index
    %67 = vector.load %arg2[%c6, %c0_74, %c0_75] : memref<9x128x128xbf16, #tpu.memory_space<vmem>>, vector<1x128x128xbf16>
    %68 = vector.shape_cast %67 : vector<1x128x128xbf16> to vector<128x128xbf16>
    %cst_76 = arith.constant dense<0.000000e+00> : vector<256x128xf32>
    %69 = tpu.matmul %65, %68, %cst_76 {dimension_numbers = #tpu.dot_dimension_numbers<[1], [0], [0], [1], [0, 0, 1, 1], [], []>} : vector<256x128xbf16>, vector<128x128xbf16>, vector<256x128xf32> -> vector<256x128xf32>
    %70 = arith.addf %66, %69 : vector<256x128xf32>
    %c0_77 = arith.constant 0 : index
    %c0_78 = arith.constant 0 : index
    %71 = vector.load %arg5[%c0_77, %c0_78] : memref<256x128xf32, #tpu.memory_space<vmem>>, vector<256x128xf32>
    tpu.vector_store %arg5[%c0_77, %c0_78], %70 {strides = array<i32>} : memref<256x128xf32, #tpu.memory_space<vmem>>, vector<256x128xf32>,
    %c0_79 = arith.constant 0 : index
    %c2_80 = arith.constant 2 : index
    %c1_81 = arith.constant 1 : index
    %c0_82 = arith.constant 0 : index
    %72 = vector.load %arg1[%c0_79, %c2_80, %c1_81, %c0_82] : memref<1x18x18x128xf32, #tpu.memory_space<vmem>>, vector<1x16x16x128xf32>
    %73 = vector.shape_cast %72 : vector<1x16x16x128xf32> to vector<16x16x128xf32>
    %74 = vector.shape_cast %73 : vector<16x16x128xf32> to vector<256x128xf32>
    %75 = arith.truncf %74 : vector<256x128xf32> to vector<256x128xbf16>
    %c0_83 = arith.constant 0 : index
    %c0_84 = arith.constant 0 : index
    %76 = vector.load %arg5[%c0_83, %c0_84] : memref<256x128xf32, #tpu.memory_space<vmem>>, vector<256x128xf32>
    %c7 = arith.constant 7 : index
    %c0_85 = arith.constant 0 : index
    %c0_86 = arith.constant 0 : index
    %77 = vector.load %arg2[%c7, %c0_85, %c0_86] : memref<9x128x128xbf16, #tpu.memory_space<vmem>>, vector<1x128x128xbf16>
    %78 = vector.shape_cast %77 : vector<1x128x128xbf16> to vector<128x128xbf16>
    %cst_87 = arith.constant dense<0.000000e+00> : vector<256x128xf32>
    %79 = tpu.matmul %75, %78, %cst_87 {dimension_numbers = #tpu.dot_dimension_numbers<[1], [0], [0], [1], [0, 0, 1, 1], [], []>} : vector<256x128xbf16>, vector<128x128xbf16>, vector<256x128xf32> -> vector<256x128xf32>
    %80 = arith.addf %76, %79 : vector<256x128xf32>
    %c0_88 = arith.constant 0 : index
    %c0_89 = arith.constant 0 : index
    %81 = vector.load %arg5[%c0_88, %c0_89] : memref<256x128xf32, #tpu.memory_space<vmem>>, vector<256x128xf32>
    tpu.vector_store %arg5[%c0_88, %c0_89], %80 {strides = array<i32>} : memref<256x128xf32, #tpu.memory_space<vmem>>, vector<256x128xf32>,
    %c0_90 = arith.constant 0 : index
    %c2_91 = arith.constant 2 : index
    %c2_92 = arith.constant 2 : index
    %c0_93 = arith.constant 0 : index
    %82 = vector.load %arg1[%c0_90, %c2_91, %c2_92, %c0_93] : memref<1x18x18x128xf32, #tpu.memory_space<vmem>>, vector<1x16x16x128xf32>
    %83 = vector.shape_cast %82 : vector<1x16x16x128xf32> to vector<16x16x128xf32>
    %84 = vector.shape_cast %83 : vector<16x16x128xf32> to vector<256x128xf32>
    %85 = arith.truncf %84 : vector<256x128xf32> to vector<256x128xbf16>
    %c0_94 = arith.constant 0 : index
    %c0_95 = arith.constant 0 : index
    %86 = vector.load %arg5[%c0_94, %c0_95] : memref<256x128xf32, #tpu.memory_space<vmem>>, vector<256x128xf32>
    %c8 = arith.constant 8 : index
    %c0_96 = arith.constant 0 : index
    %c0_97 = arith.constant 0 : index
    %87 = vector.load %arg2[%c8, %c0_96, %c0_97] : memref<9x128x128xbf16, #tpu.memory_space<vmem>>, vector<1x128x128xbf16>
    %88 = vector.shape_cast %87 : vector<1x128x128xbf16> to vector<128x128xbf16>
    %cst_98 = arith.constant dense<0.000000e+00> : vector<256x128xf32>
    %89 = tpu.matmul %85, %88, %cst_98 {dimension_numbers = #tpu.dot_dimension_numbers<[1], [0], [0], [1], [0, 0, 1, 1], [], []>} : vector<256x128xbf16>, vector<128x128xbf16>, vector<256x128xf32> -> vector<256x128xf32>
    %90 = arith.addf %86, %89 : vector<256x128xf32>
    %c0_99 = arith.constant 0 : index
    %c0_100 = arith.constant 0 : index
    %91 = vector.load %arg5[%c0_99, %c0_100] : memref<256x128xf32, #tpu.memory_space<vmem>>, vector<256x128xf32>
    tpu.vector_store %arg5[%c0_99, %c0_100], %90 {strides = array<i32>} : memref<256x128xf32, #tpu.memory_space<vmem>>, vector<256x128xf32>,
    %c0_101 = arith.constant 0 : index
    %c0_102 = arith.constant 0 : index
    %92 = vector.load %arg5[%c0_101, %c0_102] : memref<256x128xf32, #tpu.memory_space<vmem>>, vector<256x128xf32>
    %93 = vector.shape_cast %92 : vector<256x128xf32> to vector<1x16x16x128xf32>
    %c0_103 = arith.constant 0 : index
    %c0_104 = arith.constant 0 : index
    %c0_105 = arith.constant 0 : index
    %c0_106 = arith.constant 0 : index
    %94 = vector.load %arg3[%c0_103, %c0_104, %c0_105, %c0_106] : memref<1x16x16x128xf32, #tpu.memory_space<vmem>>, vector<1x16x16x128xf32>
    tpu.vector_store %arg3[%c0_103, %c0_104, %c0_105, %c0_106], %93 {strides = array<i32>} : memref<1x16x16x128xf32, #tpu.memory_space<vmem>>, vector<1x16x16x128xf32>,
    %cst_107 = arith.constant dense<0.000000e+00> : vector<128xf32>
    %95 = vector.multi_reduction <add>, %92, %cst_107 [0] : vector<256x128xf32> to vector<128xf32>
    %96 = vector.shape_cast %95 : vector<128xf32> to vector<1x128xf32>
    %97 = arith.mulf %92, %92 : vector<256x128xf32>
    %cst_108 = arith.constant dense<0.000000e+00> : vector<128xf32>
    %98 = vector.multi_reduction <add>, %97, %cst_108 [0] : vector<256x128xf32> to vector<128xf32>
    %99 = vector.shape_cast %98 : vector<128xf32> to vector<1x128xf32>
    %100 = tpu.concatenate %96, %99 in 0 : vector<1x128xf32>, vector<1x128xf32> -> vector<2x128xf32>
    %101 = vector.shape_cast %100 : vector<2x128xf32> to vector<1x2x128xf32>
    %c0_109 = arith.constant 0 : index
    %c0_110 = arith.constant 0 : index
    %c0_111 = arith.constant 0 : index
    %102 = vector.load %arg4[%c0_109, %c0_110, %c0_111] : memref<1x2x128xf32, #tpu.memory_space<vmem>>, vector<1x2x128xf32>
    tpu.vector_store %arg4[%c0_109, %c0_110, %c0_111], %101 {strides = array<i32>} : memref<1x2x128xf32, #tpu.memory_space<vmem>>, vector<1x2x128xf32>,
    return
  }
  func.func @transform_0(%arg0: i32) -> (i32, i32, i32, i32) {
    %c0_i32 = arith.constant 0 : i32
    %c0_i32_0 = arith.constant 0 : i32
    %c0_i32_1 = arith.constant 0 : i32
    %c0_i32_2 = arith.constant 0 : i32
    return %arg0, %c0_i32, %c0_i32_0, %c0_i32_1 : i32, i32, i32, i32
  }
  func.func @transform_1(%arg0: i32) -> (i32, i32, i32) {
    %c0_i32 = arith.constant 0 : i32
    %c0_i32_0 = arith.constant 0 : i32
    %c0_i32_1 = arith.constant 0 : i32
    %c0_i32_2 = arith.constant 0 : i32
    return %c0_i32, %c0_i32_0, %c0_i32_1 : i32, i32, i32
  }
  func.func @transform_2(%arg0: i32) -> (i32, i32, i32, i32) {
    %c0_i32 = arith.constant 0 : i32
    %c0_i32_0 = arith.constant 0 : i32
    %c0_i32_1 = arith.constant 0 : i32
    %c0_i32_2 = arith.constant 0 : i32
    return %arg0, %c0_i32, %c0_i32_0, %c0_i32_1 : i32, i32, i32, i32
  }
  func.func @transform_3(%arg0: i32) -> (i32, i32, i32) {
    %c0_i32 = arith.constant 0 : i32
    %c0_i32_0 = arith.constant 0 : i32
    %c0_i32_1 = arith.constant 0 : i32
    return %arg0, %c0_i32, %c0_i32_0 : i32, i32, i32
  }
}

</mosaic_0001>

<bundles_post_ra>
// kernel: tpu_custom_call.1
= control target key start
LH: loop header
LB: loop body
LE: loop exit
PB: predicated region body
PF: predicated region fallthrough
CT: control target
= control target key end

     0   :  { %9 = vsyncpa [#allocation4], 0  ;;  %s6230_s0 = inlined_call_operand.vmem [shape: f32[2,18,18,128], index: 0, kind: input, shape index: {}]   ;;  %s6231_s1 = inlined_call_operand.vmem [shape: bf16[9,128,128], index: 1, kind: input, shape index: {}]   ;;  %s6232_s2 = inlined_call_operand.hbm [shape: f32[2,16,16,128], index: 2, kind: output, shape index: {0}]   ;;  %s6233_s3 = inlined_call_operand.hbm [shape: f32[2,2,128], index: 3, kind: output, shape index: {1}]  }
   0x1   :  { %11 = vsyncpa [#allocation4 + $0x1], 0 }
   0x2   :  { %12 = vsyncpa [#allocation6], 0 }
   0x3   :  { %14 = vsyncpa [#allocation6 + $0x1], 0  ;;  %s5417_s12 = smov 0   ;;  %s5419_s13 = smov 0  }
   0x4   :  { %s5421_s14 = smov 0   ;;  %s5423_s15 = smov 0  }
   0x5 LB: > { %s5438_s16 = sadd.s32 4294967295, %s5391_s15   ;;  %s3843_s17 = sadd.s32 4294967294, %s5391_s15   ;;  %s5391_s15 = sphi %s5423_s15, %s6239_s15   ;;  %s5387_s14 = sphi %s5421_s14, %s6238_s14   ;;  %s5383_s13 = sphi %s5419_s13, %s6237_s13   ;;  %s5379_s12 = sphi %s5417_s12, %s6236_s12  }
   0x6   : > { %s5442_s18 = sadd.s32 1, %s5391_s15   ;;  %s74_s19 = sadd.s32 1, %s5387_s14 }
   0x7   : > { %s71_s20 = ssub.s32 %s5391_s15, %s5442_s18  ;;  %p84_p0 = scmp.ne.s32.totalorder %s5387_s14, %s5383_s13 }
   0x8   : > { %p72_p1 = scmp.eq.s32.totalorder %s71_s20, 0  ;;  %p85_p2 = scmp.eq.s32.totalorder %s5438_s16, 1 }
   0x9   : > { %p90_p3 = scmp.ne.s32.totalorder %s5383_s13, %s5379_s12  ;;  %p91_p4 = scmp.eq.s32.totalorder %s3843_s17, 1 }
   0xa   : > { %s5453_s21 = scalar_select %p72_p1, %s5387_s14, %s74_s19  }
   0xb   : > { %p5455_p5 = por %p85_p2, %p84_p0  ;;  %p5459_p6 = por %p91_p4, %p90_p3 }
   0xc   : > { %p3846_p7 = scmp.ge.s32.totalorder %s5391_s15, 1  ;;  %p146_p8 = scmp.lt.s32.totalorder %s5391_s15, 3 }
   0xe   : > { %p147_p9 = pnand %p3846_p7, %p146_p8 }
   0xf   : > { %v5217_v0 = vld [vmem:[%s6231_s1] sm:$0xff] (!%p147_p9)   ;;  %p175_p10 = scmp.lt.s32.totalorder (!%p147_p9), %s5438_s16, 1  ;;  %v5219_v2 = vld [vmem:[%s6231_s1 + $0x8] sm:$0xff] (!%p147_p9)   ;;  %v5221_v4 = vld [vmem:[%s6231_s1 + $0x10] sm:$0xff] (!%p147_p9)   ;;  %s4249_s10 = sshll.u32 (!%p147_p9), %s5438_s16, 12 }
  0x10   : > { %150 = sbr.rel (%p147_p9) target bundleno = 592 (0x250), region = 28  ;;  %v5218_v1 = vld [vmem:[%s6231_s1 + $0x100] sm:$0xff] (!%p147_p9)   ;;  %4466 = vmatprep.subr.bf16.mxu1 (!%p147_p9), %v5217_v0  ;;  %v5220_v3 = vld [vmem:[%s6231_s1 + $0x108] sm:$0xff] (!%p147_p9)   ;;  %v5222_v5 = vld [vmem:[%s6231_s1 + $0x110] sm:$0xff] (!%p147_p9)   ;;  %s5393_s26 = smov (!%p147_p9), [#allocation3]  }
  0x11   : > { %4658 = vmatprep.subr.bf16.mxu0 (!%p147_p9), %v5218_v1  ;;  %4467 = vmatpush3.bf16.msra.mxu1 (!%p147_p9), %v5217_v0  ;;  %v5223_v6 = vld [vmem:[%s6231_s1 + $0x18] sm:$0xff] (!%p147_p9)   ;;  %v5225_v8 = vld [vmem:[%s6231_s1 + $0x20] sm:$0xff] (!%p147_p9)   ;;  %v5227_v10 = vld [vmem:[%s6231_s1 + $0x28] sm:$0xff] (!%p147_p9)   ;;  %s5301_s27 = sshll.u32 (!%p147_p9), %s5393_s26, 4  ;;  %s5302_s27 = int_to_ptr.vmem [resolvable:$false] %s5301_s27 }
  0x12   : > { %4659 = vmatpush3.bf16.msra.mxu0 (!%p147_p9), %v5218_v1  ;;  %4468 = vmatprep.subr.bf16.mxu1 (!%p147_p9), %v5219_v2  ;;  %v5224_v7 = vld [vmem:[%s6231_s1 + $0x118] sm:$0xff] (!%p147_p9)   ;;  %v5226_v9 = vld [vmem:[%s6231_s1 + $0x120] sm:$0xff] (!%p147_p9)   ;;  %v5228_v14 = vld [vmem:[%s6231_s1 + $0x128] sm:$0xff] (!%p147_p9)   ;;  %s5303_s28 = scalar_lea.vmem (!%p147_p9), %s5302_s27, 8192 }
  0x13   : > { %4660 = vmatprep.subr.bf16.mxu0 (!%p147_p9), %v5220_v3  ;;  %v5229_v18 = vld [vmem:[%s6231_s1 + $0x30] sm:$0xff] (!%p147_p9)   ;;  %v5231_v20 = vld [vmem:[%s6231_s1 + $0x38] sm:$0xff] (!%p147_p9)   ;;  %v5233_v24 = vld [vmem:[%s6231_s1 + $0x40] sm:$0xff] (!%p147_p9)  }
  0x14   : > { %v5230_v19 = vld [vmem:[%s6231_s1 + $0x130] sm:$0xff] (!%p147_p9)   ;;  %v5232_v21 = vld [vmem:[%s6231_s1 + $0x138] sm:$0xff] (!%p147_p9)   ;;  %v5234_v27 = vld [vmem:[%s6231_s1 + $0x140] sm:$0xff] (!%p147_p9)  }
  0x15   : > { %4469 = vmatpush3.bf16.msra.mxu1 (!%p147_p9), %v5219_v2  ;;  %v5235_v34 = vld [vmem:[%s6231_s1 + $0x148] sm:$0xff] (!%p147_p9)   ;;  %v5237_v43 = vld [vmem:[%s6231_s1 + $0x150] sm:$0xff] (!%p147_p9)   ;;  %v5238_v51 = vld [vmem:[%s6231_s1 + $0x158] sm:$0xff] (!%p147_p9)  }
  0x16   : > { %4661 = vmatpush3.bf16.msra.mxu0 (!%p147_p9), %v5220_v3  ;;  %4470 = vmatprep.subr.bf16.mxu1 (!%p147_p9), %v5221_v4  ;;  %v5236_v39 = vld [vmem:[%s6231_s1 + $0x48] sm:$0xff] (!%p147_p9)   ;;  %v5239_v46 = vld [vmem:[%s6231_s1 + $0x50] sm:$0xff] (!%p147_p9)   ;;  %v5242_v55 = vld [vmem:[%s6231_s1 + $0x58] sm:$0xff] (!%p147_p9)  }
  0x17   : > { %s176_s9 = scalar_select %p175_p10, %s5438_s16, 1  ;;  %4662 = vmatprep.subr.bf16.mxu0 %v5222_v5  ;;  %v5240_v58 = vld [vmem:[%s6231_s1 + $0x160] sm:$0xff]  }
  0x18   : > { %v5245_v0 = vld [vmem:[%s6231_s1 + $0x60] sm:$0xff]  }
  0x19   : > { %s5170_s20 = smul.u32 432, %s176_s9  ;;  %4471 = vmatpush3.bf16.msra.mxu1 %v5221_v4  ;;  %v5241_v4 = vld [vmem:[%s6231_s1 + $0x168] sm:$0xff]  }
  0x1a   : > { %4663 = vmatpush3.bf16.msra.mxu0 %v5222_v5  ;;  %4472 = vmatprep.subr.bf16.mxu1 %v5223_v6 }
  0x1b   : > { %4664 = vmatprep.subr.bf16.mxu0 %v5224_v7  ;;  %s5500_s30 = scalar_lea.vmem %s6230_s0, %s5170_s20  ;;  %s6151_s20 = scalar_lea.hbm %s6232_s2, %s4249_s10 }
  0x1c   : > { %v213_v11 = vld [vmem:[%s5500_s30] sm:$0xff]  ;;  %v214_v12 = vld [vmem:[%s5500_s30 + $0x8] sm:$0xff]  ;;  %v215_v22 = vld [vmem:[%s5500_s30 + $0x18] sm:$0xff] }
  0x1d   : > { %4473 = vmatpush3.bf16.msra.mxu1 %v5223_v6  ;;  %v3962_v13 = vld [vmem:[%s5500_s30 + $0x19] sm:$0xff]  ;;  %v245_v15 = vpack.c.bf16 %v214_v12, %v213_v11  ;;  %v3963_v16 = vld [vmem:[%s5500_s30 + $0x21] sm:$0xff]  ;;  %v3964_v25 = vld [vmem:[%s5500_s30 + $0x31] sm:$0xff] }
  0x1e   : > { %4665 = vmatpush3.bf16.msra.mxu0 %v5224_v7  ;;  %4474 = vmatprep.subr.bf16.mxu1 %v5225_v8  ;;  %v5512_v17 = vpack.c.bf16 %v3963_v16, %v3962_v13  ;;  %v216_v23 = vld [vmem:[%s5500_s30 + $0x20] sm:$0xff]  ;;  %v217_v28 = vld [vmem:[%s5500_s30 + $0x30] sm:$0xff]  ;;  %v218_v29 = vld [vmem:[%s5500_s30 + $0x38] sm:$0xff] }
  0x1f   : > { %4666 = vmatprep.subr.bf16.mxu0 %v5226_v9  ;;  %4482 = vmatprep.mubr.bf16.mxu1 %v245_v15  ;;  %v3965_v26 = vld [vmem:[%s5500_s30 + $0x39] sm:$0xff]  ;;  %v246_v30 = vpack.c.bf16 %v216_v23, %v215_v22  ;;  %v3966_v31 = vld [vmem:[%s5500_s30 + $0x49] sm:$0xff]  ;;  %v3967_v32 = vld [vmem:[%s5500_s30 + $0x51] sm:$0xff]  ;;  %v5546_v35 = vpack.c.bf16 %v218_v29, %v217_v28 }
  0x20   : > { %4674 = vmatprep.mubr.bf16.mxu0 %v5512_v17  ;;  %v5541_v33 = vpack.c.bf16 %v3965_v26, %v3964_v25  ;;  %v5548_v36 = vpack.c.bf16 %v3967_v32, %v3966_v31  ;;  %v219_v37 = vld [vmem:[%s5500_s30 + $0x48] sm:$0xff]  ;;  %v220_v38 = vld [vmem:[%s5500_s30 + $0x50] sm:$0xff]  ;;  %v221_v42 = vld [vmem:[%s5500_s30 + $0x60] sm:$0xff] }
  0x21   : > { %4475 = vmatpush3.bf16.msra.mxu1 %v5225_v8  ;;  %v3968_v40 = vld [vmem:[%s5500_s30 + $0x61] sm:$0xff]  ;;  %v3969_v41 = vld [vmem:[%s5500_s30 + $0x69] sm:$0xff]  ;;  %v3970_v45 = vld [vmem:[%s5500_s30 + $0x79] sm:$0xff]  ;;  %v5570_v48 = vpack.c.bf16 %v220_v38, %v219_v37 }
  0x22   : > { %4667 = vmatpush3.bf16.msra.mxu0 %v5226_v9  ;;  %4476 = vmatprep.subr.bf16.mxu1 %v5227_v10  ;;  %v222_v44 = vld [vmem:[%s5500_s30 + $0x68] sm:$0xff]  ;;  %v5572_v49 = vpack.c.bf16 %v3969_v41, %v3968_v40  ;;  %v223_v53 = vld [vmem:[%s5500_s30 + $0x78] sm:$0xff]  ;;  %v224_v54 = vld [vmem:[%s5500_s30 + $0x80] sm:$0xff] }
  0x23   : > { %4668 = vmatprep.subr.bf16.mxu0 %v5228_v14  ;;  %v3971_v47 = vld [vmem:[%s5500_s30 + $0x81] sm:$0xff]  ;;  %v5574_v50 = vpack.c.bf16 %v222_v44, %v221_v42  ;;  %v3972_v56 = vld [vmem:[%s5500_s30 + $0x91] sm:$0xff]  ;;  %v3973_v57 = vld [vmem:[%s5500_s30 + $0x99] sm:$0xff]  ;;  %v5599_v63 = vpack.c.bf16 %v224_v54, %v223_v53 }
  0x24   : > { %v5579_v52 = vpack.c.bf16 %v3971_v47, %v3970_v45  ;;  %v225_v59 = vld [vmem:[%s5500_s30 + $0x90] sm:$0xff]  ;;  %v226_v60 = vld [vmem:[%s5500_s30 + $0x98] sm:$0xff]  ;;  %v5604_v1 = vpack.c.bf16 %v3973_v57, %v3972_v56  ;;  %v227_v5 = vld [vmem:[%s5500_s30 + $0xa8] sm:$0xff] }
  0x25   : > { %4477 = vmatpush3.bf16.msra.mxu1 %v5227_v10  ;;  %v3974_v61 = vld [vmem:[%s5500_s30 + $0xa9] sm:$0xff]  ;;  %v3975_v62 = vld [vmem:[%s5500_s30 + $0xb1] sm:$0xff]  ;;  %v5606_v2 = vpack.c.bf16 %v226_v60, %v225_v59  ;;  %v3976_v8 = vld [vmem:[%s5500_s30 + $0xc1] sm:$0xff] }
  0x26   : > { %4669 = vmatpush3.bf16.msra.mxu0 %v5228_v14  ;;  %4478 = vmatprep.subr.bf16.mxu1 %v5229_v18  ;;  %v5608_v3 = vpack.c.bf16 %v3975_v62, %v3974_v61  ;;  %v228_v6 = vld [vmem:[%s5500_s30 + $0xb0] sm:$0xff]  ;;  %v5247_v7 = vld [vmem:[%s6231_s1 + $0x68] sm:$0xff]   ;;  %v229_v10 = vld [vmem:[%s5500_s30 + $0xc0] sm:$0xff] }
  0x27   : > { %4670 = vmatprep.subr.bf16.mxu0 %v5230_v19  ;;  %v3977_v9 = vld [vmem:[%s5500_s30 + $0xc9] sm:$0xff]  ;;  %v4018_v13 = vld [vmem:[%s5500_s30 + $0x1a] sm:$0xff]  ;;  %v5631_v15 = vpack.c.bf16 %v228_v6, %v227_v5  ;;  %v4023_v31 = vld [vmem:[%s5500_s30 + $0x52] sm:$0xff] }
  0x28   : > { %v230_v11 = vld [vmem:[%s5500_s30 + $0xc8] sm:$0xff]  ;;  %v5243_v12 = vld [vmem:[%s6231_s1 + $0x170] sm:$0xff]   ;;  %v231_v22 = vld [vmem:[%s5500_s30 + $0xd8] sm:$0xff] }
  0x29   : > { %4479 = vmatpush3.bf16.msra.mxu1 %v5229_v18  ;;  %v4019_v14 = vld [vmem:[%s5500_s30 + $0x22] sm:$0xff]  ;;  %v5249_v16 = vld [vmem:[%s6231_s1 + $0x70] sm:$0xff]   ;;  %v5636_v18 = vpack.c.bf16 %v3977_v9, %v3976_v8  ;;  %v5251_v25 = vld [vmem:[%s6231_s1 + $0x78] sm:$0xff]  }
  0x2a   : > { %4671 = vmatpush3.bf16.msra.mxu0 %v5230_v19  ;;  %4480 = vmatprep.subr.bf16.mxu1 %v5231_v20  ;;  %v5638_v19 = vpack.c.bf16 %v230_v11, %v229_v10  ;;  %v232_v23 = vld [vmem:[%s5500_s30 + $0xe0] sm:$0xff]  ;;  %v234_v28 = vld [vmem:[%s5500_s30 + $0xf8] sm:$0xff]  ;;  %v235_v40 = vld [vmem:[%s5500_s30 + $0x108] sm:$0xff] }
  0x2b   : > { %4672 = vmatprep.subr.bf16.mxu0 %v5232_v21  ;;  %v4021_v26 = vld [vmem:[%s5500_s30 + $0x3a] sm:$0xff]  ;;  %v5663_v32 = vpack.c.bf16 %v232_v23, %v231_v22  ;;  %v5248_v41 = vld [vmem:[%s6231_s1 + $0x188] sm:$0xff]   ;;  %v236_v42 = vld [vmem:[%s5500_s30 + $0x110] sm:$0xff] }
  0x2c   : > { %v5246_v29 = vld [vmem:[%s6231_s1 + $0x180] sm:$0xff]   ;;  %v4025_v44 = vld [vmem:[%s5500_s30 + $0x6a] sm:$0xff]  ;;  %v5695_v54 = vpack.c.bf16 %v236_v42, %v235_v40  ;;  %v5252_v59 = vld [vmem:[%s6231_s1 + $0x198] sm:$0xff]  }
  0x2d   : > { %4481 = vmatpush3.bf16.msra.mxu1 %v5231_v20  ;;  %v5640_v20 = vpack.c.bf16 %v4019_v14, %v4018_v13  ;;  %v237_v45 = vld [vmem:[%s5500_s30 + $0x120] sm:$0xff]  ;;  %v5250_v53 = vld [vmem:[%s6231_s1 + $0x190] sm:$0xff]   ;;  %v5256_v14 = vld [vmem:[%s6231_s1 + $0x1a8] sm:$0xff]  }
  0x2e   : > { %4673 = vmatpush3.bf16.msra.mxu0 %v5232_v21  ;;  %4514 = vmatprep.subr.bf16.mxu1 %v5233_v24  ;;  %v5244_v21 = vld [vmem:[%s6231_s1 + $0x178] sm:$0xff]   ;;  %v240_v60 = vld [vmem:[%s5500_s30 + $0x140] sm:$0xff]  ;;  %v4030_v5 = vld [vmem:[%s5500_s30 + $0xaa] sm:$0xff] }
  0x2f   : > { %4706 = vmatprep.subr.bf16.mxu0 %v5234_v27  ;;  %v4026_v47 = vld [vmem:[%s5500_s30 + $0x7a] sm:$0xff]  ;;  %v4028_v61 = vld [vmem:[%s5500_s30 + $0x92] sm:$0xff]  ;;  %v583_v23 = vld [vmem:[%s5500_s30 + $0x9] sm:$0xff] }
  0x30   : > { %4483 = vmatmul.mubr.bf16.vlgmr.msra.gmra.mrb[0].mxu1 %v246_v30  ;;  %v4022_v30 = vld [vmem:[%s5500_s30 + $0x4a] sm:$0xff]  ;;  %v4029_v62 = vld [vmem:[%s5500_s30 + $0x9a] sm:$0xff]  ;;  %v4031_v6 = vld [vmem:[%s5500_s30 + $0xb2] sm:$0xff] }
  0x31   : > { %4675 = vmatmul.mubr.bf16.vlgmr.msra.gmra.mrb[0].mxu0 %v5541_v33  ;;  %4515 = vmatpush3.bf16.msra.mxu1 %v5233_v24  ;;  %v4020_v24 = vld [vmem:[%s5500_s30 + $0x32] sm:$0xff]  ;;  %v5723_v9 = vpack.c.bf16 %v4029_v62, %v4028_v61  ;;  %v5727_v11 = vpack.c.bf16 %v4031_v6, %v4030_v5  ;;  %v582_v22 = vld [vmem:[%s5500_s30 + $0x1] sm:$0xff]  ;;  %v4038_v42 = vld [vmem:[%s5500_s30 + $0x10a] sm:$0xff] }
  0x32   : > { %4707 = vmatpush3.bf16.msra.mxu0 %v5234_v27  ;;  %4486 = vmatprep.mubr.bf16.mxu1 %v5546_v35  ;;  %v233_v27 = vld [vmem:[%s5500_s30 + $0xf0] sm:$0xff]  ;;  %v5670_v37 = vpack.c.bf16 %v4021_v26, %v4020_v24  ;;  %v4034_v24 = vld [vmem:[%s5500_s30 + $0xda] sm:$0xff] }
  0x33   : > { %4708 = vmatprep.subr.bf16.mxu0 %v5235_v34  ;;  %4678 = vmatprep.mubr.bf16.mxu0 %v5548_v36  ;;  %v5672_v38 = vpack.c.bf16 %v234_v28, %v233_v27  ;;  %v244_v13 = vld [vmem:[%s5500_s30 + $0x170] sm:$0xff]  ;;  %v4045_v62 = vld [vmem:[%s5500_s30 + $0x15a] sm:$0xff] }
  0x34   : > { %4516 = vmatprep.subr.bf16.mxu1 %v5236_v39  ;;  %v5258_v26 = vld [vmem:[%s6231_s1 + $0x1b0] sm:$0xff]   ;;  %v5261_v5 = vld [vmem:[%s6231_s1 + $0xa0] sm:$0xff]  }
  0x35   : > { %4517 = vmatpush3.bf16.msra.mxu1 %v5236_v39  ;;  %v5674_v39 = vpack.c.bf16 %v4023_v31, %v4022_v30  ;;  %v5260_v31 = vld [vmem:[%s6231_s1 + $0x1b8] sm:$0xff]  }
  0x36   : > { %4709 = vmatpush3.bf16.msra.mxu0 %v5235_v34  ;;  %4518 = vmatprep.subr.bf16.mxu1 %v5239_v46  ;;  %v5668_v34 = vld [vmem:[%s6231_s1 + $0x80] sm:$0xff]   ;;  %v4036_v40 = vld [vmem:[%s5500_s30 + $0xf2] sm:$0xff] }
  0x37   : > { %4710 = vmatprep.subr.bf16.mxu0 %v5237_v43  ;;  %v4044_v61 = vld [vmem:[%s5500_s30 + $0x152] sm:$0xff] }
  0x38   : > { %4487 = vmatmul.mubr.bf16.gmra.mrb[4].mxu1 %v5570_v48  ;;  %v5806_v6 = vpack.c.bf16 %v4045_v62, %v4044_v61  ;;  %v5274_v61 = vld [vmem:[%s6231_s1 + $0x1f0] sm:$0xff]  }
  0x39   : > { %4679 = vmatmul.mubr.bf16.gmra.mrb[4].mxu0 %v5572_v49  ;;  %4490 = vmatprep.mubr.bf16.mxu1 %v5574_v50 }
  0x3a   : > { %4711 = vmatpush3.bf16.msra.mxu0 %v5237_v43  ;;  %4682 = vmatprep.mubr.bf16.mxu0 %v5579_v52  ;;  %v4024_v43 = vld [vmem:[%s5500_s30 + $0x62] sm:$0xff] }
  0x3b   : > { %4712 = vmatprep.subr.bf16.mxu0 %v5238_v51  ;;  %4519 = vmatpush3.bf16.msra.mxu1 %v5239_v46  ;;  %v238_v46 = vld [vmem:[%s5500_s30 + $0x128] sm:$0xff] }
  0x3c   : > { %4520 = vmatprep.subr.bf16.mxu1 %v5242_v55  ;;  %v5699_v56 = vpack.c.bf16 %v238_v46, %v237_v45 }
  0x3e   : > { %4713 = vmatpush3.bf16.msra.mxu0 %v5238_v51  ;;  %v4027_v51 = vld [vmem:[%s5500_s30 + $0x82] sm:$0xff] }
  0x3f   : > { %4714 = vmatprep.subr.bf16.mxu0 %v5240_v58  ;;  %4521 = vmatpush3.bf16.msra.mxu1 %v5242_v55  ;;  %v5697_v55 = vpack.c.bf16 %v4025_v44, %v4024_v43  ;;  %v5701_v57 = vpack.c.bf16 %v4027_v51, %v4026_v47  ;;  %v4039_v43 = vld [vmem:[%s5500_s30 + $0x112] sm:$0xff]  ;;  %v5766_v44 = vld [vmem:[%s6231_s1 + $0x1c0] sm:$0xff]   ;;  %v5255_v47 = vld [vmem:[%s6231_s1 + $0x88] sm:$0xff]  }
  0x40   : > { %4491 = vmatmul.mubr.bf16.gmra.mrb[8].mxu1 %v5599_v63  ;;  %4522 = vmatprep.subr.bf16.mxu1 %v5245_v0  ;;  %v5770_v46 = vpack.c.bf16 %v4039_v43, %v4038_v42  ;;  %v4040_v51 = vld [vmem:[%s5500_s30 + $0x122] sm:$0xff]  ;;  %v5268_v42 = vld [vmem:[%s6231_s1 + $0x1d8] sm:$0xff]  }
  0x41   : > { %4683 = vmatmul.mubr.bf16.gmra.mrb[8].mxu0 %v5604_v1  ;;  %4494 = vmatprep.mubr.bf16.mxu1 %v5606_v2  ;;  %v609_v43 = vld [vmem:[%s5500_s30 + $0x141] sm:$0xff] }
  0x42   : > { %4715 = vmatpush3.bf16.msra.mxu0 %v5240_v58  ;;  %4686 = vmatprep.mubr.bf16.mxu0 %v5608_v3  ;;  %v239_v58 = vld [vmem:[%s5500_s30 + $0x138] sm:$0xff] }
  0x43   : > { %4716 = vmatprep.subr.bf16.mxu0 %v5241_v4  ;;  %4523 = vmatpush3.bf16.msra.mxu1 %v5245_v0  ;;  %v241_v0 = vld [vmem:[%s5500_s30 + $0x150] sm:$0xff]  ;;  %v5721_v8 = vpack.c.bf16 %v240_v60, %v239_v58  ;;  %v4042_v58 = vld [vmem:[%s5500_s30 + $0x13a] sm:$0xff] }
  0x44   : > { %4524 = vmatprep.subr.bf16.mxu1 %v5247_v7 }
  0x46   : > { %4717 = vmatpush3.bf16.msra.mxu0 %v5241_v4  ;;  %v242_v4 = vld [vmem:[%s5500_s30 + $0x158] sm:$0xff] }
  0x47   : > { %4718 = vmatprep.subr.bf16.mxu0 %v5243_v12  ;;  %4525 = vmatpush3.bf16.msra.mxu1 %v5247_v7  ;;  %v5254_v7 = vld [vmem:[%s6231_s1 + $0x1a0] sm:$0xff]   ;;  %v5725_v10 = vpack.c.bf16 %v242_v4, %v241_v0  ;;  %v4046_v0 = vld [vmem:[%s5500_s30 + $0x16a] sm:$0xff]  ;;  %v4047_v4 = vld [vmem:[%s5500_s30 + $0x172] sm:$0xff] }
  0x48   : > { %4495 = vmatmul.mubr.bf16.gmra.mrb[12].mxu1 %v5631_v15  ;;  %4526 = vmatprep.subr.bf16.mxu1 %v5249_v16 }
  0x49   : > { %4687 = vmatmul.mubr.bf16.gmra.mrb[12].mxu0 %v5636_v18  ;;  %4498 = vmatprep.mubr.bf16.mxu1 %v5638_v19 }
  0x4a   : > { %4719 = vmatpush3.bf16.msra.mxu0 %v5243_v12  ;;  %4722 = vmatprep.mubr.bf16.mxu0 %v5640_v20  ;;  %v243_v12 = vld [vmem:[%s5500_s30 + $0x168] sm:$0xff] }
  0x4b   : > { %4720 = vmatprep.subr.bf16.mxu0 %v5244_v21  ;;  %4527 = vmatpush3.bf16.msra.mxu1 %v5249_v16  ;;  %v4032_v16 = vld [vmem:[%s5500_s30 + $0xc2] sm:$0xff]  ;;  %v5747_v27 = vpack.c.bf16 %v244_v13, %v243_v12  ;;  %v4049_v12 = vld [vmem:[%s5500_s30 + $0x18a] sm:$0xff] }
  0x4c   : > { %4528 = vmatprep.subr.bf16.mxu1 %v5251_v25  ;;  %v5265_v13 = vld [vmem:[%s6231_s1 + $0xb0] sm:$0xff]  }
  0x4e   : > { %4721 = vmatpush3.bf16.msra.mxu0 %v5244_v21  ;;  %v4033_v21 = vld [vmem:[%s5500_s30 + $0xca] sm:$0xff] }
  0x4f   : > { %4754 = vmatprep.subr.bf16.mxu0 %v5246_v29  ;;  %4529 = vmatpush3.bf16.msra.mxu1 %v5251_v25  ;;  %v4035_v25 = vld [vmem:[%s5500_s30 + $0xe2] sm:$0xff]  ;;  %v5749_v28 = vpack.c.bf16 %v4033_v21, %v4032_v16  ;;  %v602_v21 = vld [vmem:[%s5500_s30 + $0xf1] sm:$0xff] }
  0x50   : > { %4499 = vmatmul.mubr.bf16.gmra.mrb[16].mxu1 %v5663_v32  ;;  %4562 = vmatprep.subr.bf16.mxu1 %v5668_v34  ;;  %v5751_v30 = vpack.c.bf16 %v4035_v25, %v4034_v24  ;;  %v601_v16 = vld [vmem:[%s5500_s30 + $0xe1] sm:$0xff]  ;;  %v604_v25 = vld [vmem:[%s5500_s30 + $0x109] sm:$0xff] }
  0x51   : > { %4723 = vmatmul.mubr.bf16.vlgmr.msra.gmra.mrb[0].mxu0 %v5670_v37  ;;  %4502 = vmatprep.mubr.bf16.mxu1 %v5672_v38 }
  0x52   : > { %4755 = vmatpush3.bf16.msra.mxu0 %v5246_v29  ;;  %4726 = vmatprep.mubr.bf16.mxu0 %v5674_v39  ;;  %v614_v29 = vpack.c.bf16 %v583_v23, %v582_v22  ;;  %v603_v22 = vld [vmem:[%s5500_s30 + $0xf9] sm:$0xff] }
  0x53   : > { %4756 = vmatprep.subr.bf16.mxu0 %v5248_v41  ;;  %v5835_v23 = vld [vmem:[%s6231_s1 + $0xc0] sm:$0xff]  }
  0x56   : > { %4757 = vmatpush3.bf16.msra.mxu0 %v5248_v41  ;;  %v4037_v41 = vld [vmem:[%s5500_s30 + $0xfa] sm:$0xff] }
  0x57   : > { %4758 = vmatprep.subr.bf16.mxu0 %v5250_v53  ;;  %v5768_v45 = vpack.c.bf16 %v4037_v41, %v4036_v40  ;;  %v5266_v40 = vld [vmem:[%s6231_s1 + $0x1d0] sm:$0xff]  }
  0x58   : > { %4503 = vmatmul.mubr.bf16.gmra.mrb[20].mxu1 %v5695_v54 }
  0x59   : > { %4727 = vmatmul.mubr.bf16.gmra.mrb[4].mxu0 %v5697_v55  ;;  %4506 = vmatprep.mubr.bf16.mxu1 %v5699_v56 }
  0x5a   : > { %4730 = vmatprep.mubr.bf16.mxu0 %v5701_v57  ;;  %4759 = vmatpush3.bf16.msra.mxu0 %v5250_v53  ;;  %v4041_v53 = vld [vmem:[%s5500_s30 + $0x12a] sm:$0xff] }
  0x5b   : > { %4760 = vmatprep.subr.bf16.mxu0 %v5252_v59  ;;  %v5788_v60 = vpack.c.bf16 %v4041_v53, %v4040_v51  ;;  %v5270_v51 = vld [vmem:[%s6231_s1 + $0x1e0] sm:$0xff]  }
  0x5e   : > { %4761 = vmatpush3.bf16.msra.mxu0 %v5252_v59  ;;  %v5257_v59 = vld [vmem:[%s6231_s1 + $0x90] sm:$0xff]  }
  0x5f   : > { %4762 = vmatprep.subr.bf16.mxu0 %v5254_v7 }
  0x60   : > { %4507 = vmatmul.mubr.bf16.gmra.mrb[24].mxu1 %v5721_v8 }
  0x61   : > { %4731 = vmatmul.mubr.bf16.gmra.mrb[8].mxu0 %v5723_v9  ;;  %4510 = vmatprep.mubr.bf16.mxu1 %v5725_v10 }
  0x62   : > { %4734 = vmatprep.mubr.bf16.mxu0 %v5727_v11  ;;  %4763 = vmatpush3.bf16.msra.mxu0 %v5254_v7  ;;  %v4048_v7 = vld [vmem:[%s5500_s30 + $0x182] sm:$0xff] }
  0x63   : > { %4764 = vmatprep.subr.bf16.mxu0 %v5256_v14 }
  0x66   : > { %4765 = vmatpush3.bf16.msra.mxu0 %v5256_v14  ;;  %v2110_v14 = vpack.c.bf16 %v4049_v12, %v4048_v7  ;;  %v4132_v7 = vld [vmem:[%s5500_s30 + $0x49] sm:$0xff]  ;;  %v4133_v12 = vld [vmem:[%s5500_s30 + $0x51] sm:$0xff] }
  0x67   : > { %4766 = vmatprep.subr.bf16.mxu0 %v5258_v26 }
  0x68   : > { %4511 = vmatmul.mubr.bf16.gmra.mrb[28].mxu1 %v5747_v27 }
  0x69   : > { %4735 = vmatmul.mubr.bf16.gmra.mrb[12].mxu0 %v5749_v28  ;;  %4530 = vmatprep.mubr.bf16.mxu1 %v614_v29  ;;  %v606_v29 = vld [vmem:[%s5500_s30 + $0x121] sm:$0xff] }
  0x6a   : > { %4738 = vmatprep.mubr.bf16.mxu0 %v5751_v30  ;;  %4767 = vmatpush3.bf16.msra.mxu0 %v5258_v26  ;;  %v605_v26 = vld [vmem:[%s5500_s30 + $0x111] sm:$0xff] }
  0x6b   : > { %4768 = vmatprep.subr.bf16.mxu0 %v5260_v31 }
  0x6e   : > { %4769 = vmatpush3.bf16.msra.mxu0 %v5260_v31  ;;  %v607_v31 = vld [vmem:[%s5500_s30 + $0x129] sm:$0xff] }
  0x6f   : > { %4802 = vmatprep.subr.bf16.mxu0 %v5766_v44  ;;  %v5859_v41 = vpack.c.bf16 %v607_v31, %v606_v29  ;;  %v4143_v29 = vld [vmem:[%s5500_s30 + $0xc9] sm:$0xff]  ;;  %v5285_v31 = vld [vmem:[%s6231_s1 + $0x220] sm:$0xff]  }
  0x70   : > { %4531 = vmatmul.mubr.bf16.vlgmr.msra.gmra.mrb[0].mxu1 %v5512_v17  ;;  %v4043_v17 = vld [vmem:[%s5500_s30 + $0x142] sm:$0xff] }
  0x71   : > { %4739 = vmatmul.mubr.bf16.gmra.mrb[16].mxu0 %v5768_v45  ;;  %4563 = vmatpush3.bf16.msra.mxu1 %v5668_v34  ;;  %v5790_v34 = vpack.c.bf16 %v4043_v17, %v4042_v58  ;;  %v612_v58 = vld [vmem:[%s5500_s30 + $0x169] sm:$0xff] }
  0x72   : > { %4534 = vmatprep.mubr.bf16.mxu1 %v5541_v33  ;;  %4742 = vmatprep.mubr.bf16.mxu0 %v5770_v46  ;;  %v5259_v33 = vld [vmem:[%s6231_s1 + $0x98] sm:$0xff]   ;;  %v952_v17 = vld [vmem:[%s5500_s30 + $0x2] sm:$0xff] }
  0x73   : > { %4564 = vmatprep.subr.bf16.mxu1 %v5255_v47 }
  0x75   : > { %4565 = vmatpush3.bf16.msra.mxu1 %v5255_v47  ;;  %v611_v47 = vld [vmem:[%s5500_s30 + $0x159] sm:$0xff] }
  0x76   : > { %4566 = vmatprep.subr.bf16.mxu1 %v5257_v59 }
  0x78   : > { %4535 = vmatmul.mubr.bf16.gmra.mrb[4].mxu1 %v5548_v36  ;;  %v5808_v36 = vpack.c.bf16 %v4047_v4, %v4046_v0  ;;  %v5271_v4 = vld [vmem:[%s6231_s1 + $0xc8] sm:$0xff]  }
  0x79   : > { %4743 = vmatmul.mubr.bf16.gmra.mrb[20].mxu0 %v5788_v60  ;;  %4538 = vmatprep.mubr.bf16.mxu1 %v5572_v49  ;;  %v5263_v49 = vld [vmem:[%s6231_s1 + $0xa8] sm:$0xff]  }
  0x7a   : > { %4746 = vmatprep.mubr.bf16.mxu0 %v5790_v34  ;;  %4567 = vmatpush3.bf16.msra.mxu1 %v5257_v59  ;;  %v613_v59 = vld [vmem:[%s5500_s30 + $0x171] sm:$0xff] }
  0x7b   : > { %4568 = vmatprep.subr.bf16.mxu1 %v5259_v33  ;;  %v5893_v62 = vpack.c.bf16 %v613_v59, %v612_v58  ;;  %v3913_v58 = vld [vmem:[%s5500_s30 + $0x68] sm:$0xff]  ;;  %v3914_v59 = vld [vmem:[%s5500_s30 + $0x78] sm:$0xff] }
  0x7e   : > { %4569 = vmatpush3.bf16.msra.mxu1 %v5259_v33  ;;  %v953_v33 = vld [vmem:[%s5500_s30 + $0xa] sm:$0xff] }
  0x7f   : > { %4570 = vmatprep.subr.bf16.mxu1 %v5261_v5  ;;  %v984_v0 = vpack.c.bf16 %v953_v33, %v952_v17  ;;  %v3915_v17 = vld [vmem:[%s5500_s30 + $0x80] sm:$0xff]  ;;  %v5290_v33 = vld [vmem:[%s6231_s1 + $0x108] sm:$0xff]  }
  0x80   : > { %4539 = vmatmul.mubr.bf16.gmra.mrb[8].mxu1 %v5579_v52  ;;  %v5267_v52 = vld [vmem:[%s6231_s1 + $0xb8] sm:$0xff]  }
  0x81   : > { %4747 = vmatmul.mubr.bf16.gmra.mrb[24].mxu0 %v5806_v6  ;;  %4542 = vmatprep.mubr.bf16.mxu1 %v5604_v1  ;;  %v600_v1 = vld [vmem:[%s5500_s30 + $0xd9] sm:$0xff] }
  0x82   : > { %4750 = vmatprep.mubr.bf16.mxu0 %v5808_v36  ;;  %4571 = vmatpush3.bf16.msra.mxu1 %v5261_v5  ;;  %v5837_v24 = vpack.c.bf16 %v601_v16, %v600_v1  ;;  %v4131_v5 = vld [vmem:[%s5500_s30 + $0x39] sm:$0xff] }
  0x83   : > { %4572 = vmatprep.subr.bf16.mxu1 %v5263_v49  ;;  %v4136_v16 = vld [vmem:[%s5500_s30 + $0x79] sm:$0xff] }
  0x86   : > { %4573 = vmatpush3.bf16.msra.mxu1 %v5263_v49 }
  0x87   : > { %4574 = vmatprep.subr.bf16.mxu1 %v5265_v13 }
  0x88   : > { %4543 = vmatmul.mubr.bf16.gmra.mrb[12].mxu1 %v5608_v3 }
  0x89   : > { %4751 = vmatmul.mubr.bf16.gmra.mrb[28].mxu0 %v2110_v14  ;;  %4546 = vmatprep.mubr.bf16.mxu1 %v5636_v18  ;;  %v5839_v18 = vpack.c.bf16 %v603_v22, %v602_v21  ;;  %v4135_v14 = vld [vmem:[%s5500_s30 + $0x69] sm:$0xff]  ;;  %v4137_v21 = vld [vmem:[%s5500_s30 + $0x81] sm:$0xff]  ;;  %v4138_v22 = vld [vmem:[%s5500_s30 + $0x91] sm:$0xff] }
  0x8a   : > { %4770 = vmatprep.mubr.bf16.mxu0 %v5546_v35  ;;  %4575 = vmatpush3.bf16.msra.mxu1 %v5265_v13  ;;  %v5264_v35 = vld [vmem:[%s6231_s1 + $0x1c8] sm:$0xff]  }
  0x8b   : > { %4576 = vmatprep.subr.bf16.mxu1 %v5267_v52  ;;  %v4134_v13 = vld [vmem:[%s5500_s30 + $0x61] sm:$0xff] }
  0x8c   : > { %v2838_v1 = vpack.c.bf16 %v4135_v14, %v4134_v13  ;;  %v4187_v13 = vld [vmem:[%s5500_s30 + $0x3a] sm:$0xff]  ;;  %v5294_v14 = vld [vmem:[%s6231_s1 + $0x128] sm:$0xff]  }
  0x8e   : > { %4577 = vmatpush3.bf16.msra.mxu1 %v5267_v52  ;;  %v2837_v52 = vpack.c.bf16 %v4133_v12, %v4132_v7  ;;  %v3923_v7 = vld [vmem:[%s5500_s30 + $0xe0] sm:$0xff]  ;;  %v4186_v12 = vld [vmem:[%s5500_s30 + $0x32] sm:$0xff] }
  0x8f   : > { %4610 = vmatprep.subr.bf16.mxu1 %v5835_v23 }
  0x90   : > { %4547 = vmatmul.mubr.bf16.gmra.mrb[16].mxu1 %v5837_v24 }
  0x91   : > { %4771 = vmatmul.mubr.bf16.vlgmr.msra.gmra.mrb[0].mxu0 %v5570_v48  ;;  %4550 = vmatprep.mubr.bf16.mxu1 %v5839_v18  ;;  %v5857_v48 = vpack.c.bf16 %v605_v26, %v604_v25  ;;  %v2839_v25 = vpack.c.bf16 %v4137_v21, %v4136_v16  ;;  %v5295_v16 = vld [vmem:[%s6231_s1 + $0x130] sm:$0xff]  }
  0x92   : > { %4803 = vmatpush3.bf16.msra.mxu0 %v5766_v44  ;;  %4774 = vmatprep.mubr.bf16.mxu0 %v5574_v50  ;;  %v608_v50 = vld [vmem:[%s5500_s30 + $0x139] sm:$0xff]  ;;  %v610_v44 = vld [vmem:[%s5500_s30 + $0x151] sm:$0xff] }
  0x93   : > { %4804 = vmatprep.subr.bf16.mxu0 %v5264_v35  ;;  %v5875_v53 = vpack.c.bf16 %v609_v43, %v608_v50  ;;  %v5287_v50 = vld [vmem:[%s6231_s1 + $0x230] sm:$0xff]  }
  0x94   : > { %v3924_v21 = vld [vmem:[%s5500_s30 + $0xf0] sm:$0xff] }
  0x96   : > { %4805 = vmatpush3.bf16.msra.mxu0 %v5264_v35  ;;  %v5282_v35 = vld [vmem:[%s6231_s1 + $0x210] sm:$0xff]  }
  0x97   : > { %4806 = vmatprep.subr.bf16.mxu0 %v5266_v40 }
  0x98   : > { %4551 = vmatmul.mubr.bf16.gmra.mrb[20].mxu1 %v5857_v48 }
  0x99   : > { %4775 = vmatmul.mubr.bf16.gmra.mrb[4].mxu0 %v5599_v63  ;;  %4554 = vmatprep.mubr.bf16.mxu1 %v5859_v41  ;;  %v5877_v63 = vpack.c.bf16 %v611_v47, %v610_v44  ;;  %v3910_v44 = vld [vmem:[%s5500_s30 + $0x48] sm:$0xff]  ;;  %v3911_v47 = vld [vmem:[%s5500_s30 + $0x50] sm:$0xff] }
  0x9a   : > { %4778 = vmatprep.mubr.bf16.mxu0 %v5606_v2  ;;  %4807 = vmatpush3.bf16.msra.mxu0 %v5266_v40  ;;  %v5272_v2 = vld [vmem:[%s6231_s1 + $0x1e8] sm:$0xff]  }
  0x9b   : > { %4808 = vmatprep.subr.bf16.mxu0 %v5268_v42 }
  0x9e   : > { %4809 = vmatpush3.bf16.msra.mxu0 %v5268_v42  ;;  %v3907_v42 = vld [vmem:[%s5500_s30 + $0x20] sm:$0xff] }
  0x9f   : > { %4810 = vmatprep.subr.bf16.mxu0 %v5270_v51 }
  0xa0   : > { %4555 = vmatmul.mubr.bf16.gmra.mrb[24].mxu1 %v5875_v53 }
  0xa1   : > { %4779 = vmatmul.mubr.bf16.gmra.mrb[8].mxu0 %v5631_v15  ;;  %4558 = vmatprep.mubr.bf16.mxu1 %v5877_v63  ;;  %v5276_v15 = vld [vmem:[%s6231_s1 + $0x1f8] sm:$0xff]  }
  0xa2   : > { %4782 = vmatprep.mubr.bf16.mxu0 %v5638_v19  ;;  %4811 = vmatpush3.bf16.msra.mxu0 %v5270_v51  ;;  %v5278_v19 = vld [vmem:[%s6231_s1 + $0x200] sm:$0xff]  }
  0xa3   : > { %4812 = vmatprep.subr.bf16.mxu0 %v5272_v2 }
  0xa6   : > { %4813 = vmatpush3.bf16.msra.mxu0 %v5272_v2  ;;  %v1357_v2 = vpack.c.bf16 %v3911_v47, %v3910_v44  ;;  %v4194_v44 = vld [vmem:[%s5500_s30 + $0x92] sm:$0xff]  ;;  %v4195_v47 = vld [vmem:[%s5500_s30 + $0x9a] sm:$0xff] }
  0xa7   : > { %4814 = vmatprep.subr.bf16.mxu0 %v5274_v61 }
  0xa8   : > { %4559 = vmatmul.mubr.bf16.gmra.mrb[28].mxu1 %v5893_v62 }
  0xa9   : > { %4783 = vmatmul.mubr.bf16.gmra.mrb[12].mxu0 %v5663_v32  ;;  %4578 = vmatprep.mubr.bf16.mxu1 %v984_v0  ;;  %v5273_v32 = vld [vmem:[%s6231_s1 + $0xd0] sm:$0xff]   ;;  %v1359_v0 = vpack.c.bf16 %v3915_v17, %v3914_v59  ;;  %v3933_v17 = vld [vmem:[%s5500_s30 + $0x158] sm:$0xff] }
  0xaa   : > { %4786 = vmatprep.mubr.bf16.mxu0 %v5672_v38  ;;  %4815 = vmatpush3.bf16.msra.mxu0 %v5274_v61  ;;  %v4103_v38 = vld [vmem:[%s5500_s30 + $0x188] sm:$0xff]  ;;  %v3932_v59 = vld [vmem:[%s5500_s30 + $0x150] sm:$0xff] }
  0xab   : > { %4816 = vmatprep.subr.bf16.mxu0 %v5276_v15 }
  0xae   : > { %4817 = vmatpush3.bf16.msra.mxu0 %v5276_v15  ;;  %v5291_v15 = vld [vmem:[%s6231_s1 + $0x110] sm:$0xff]  }
  0xaf   : > { %4850 = vmatprep.subr.bf16.mxu0 %v5278_v19 }
  0xb0   : > { %4579 = vmatmul.mubr.bf16.vlgmr.msra.gmra.mrb[0].mxu1 %v5640_v20  ;;  %v5275_v20 = vld [vmem:[%s6231_s1 + $0xd8] sm:$0xff]  }
  0xb1   : > { %4787 = vmatmul.mubr.bf16.gmra.mrb[16].mxu0 %v5695_v54  ;;  %4611 = vmatpush3.bf16.msra.mxu1 %v5835_v23  ;;  %v5277_v54 = vld [vmem:[%s6231_s1 + $0xe0] sm:$0xff]  }
  0xb2   : > { %4582 = vmatprep.mubr.bf16.mxu1 %v5670_v37  ;;  %4790 = vmatprep.mubr.bf16.mxu0 %v5699_v56  ;;  %v4102_v37 = vld [vmem:[%s5500_s30 + $0x180] sm:$0xff] }
  0xb3   : > { %4612 = vmatprep.subr.bf16.mxu1 %v5271_v4  ;;  %v5927_v56 = vpack.c.bf16 %v4103_v38, %v4102_v37  ;;  %v4139_v23 = vld [vmem:[%s5500_s30 + $0x99] sm:$0xff]  ;;  %v4158_v37 = vld [vmem:[%s5500_s30 + $0x181] sm:$0xff]  ;;  %v4159_v38 = vld [vmem:[%s5500_s30 + $0x189] sm:$0xff] }
  0xb4   : > { %v2840_v26 = vpack.c.bf16 %v4139_v23, %v4138_v22  ;;  %v3925_v22 = vld [vmem:[%s5500_s30 + $0xf8] sm:$0xff]  ;;  %v4188_v23 = vld [vmem:[%s5500_s30 + $0x4a] sm:$0xff] }
  0xb5   : > { %4613 = vmatpush3.bf16.msra.mxu1 %v5271_v4  ;;  %v3917_v4 = vld [vmem:[%s5500_s30 + $0x98] sm:$0xff] }
  0xb6   : > { %4614 = vmatprep.subr.bf16.mxu1 %v5273_v32 }
  0xb8   : > { %4583 = vmatmul.mubr.bf16.gmra.mrb[4].mxu1 %v5674_v39  ;;  %v5279_v39 = vld [vmem:[%s6231_s1 + $0xe8] sm:$0xff]  }
  0xb9   : > { %4791 = vmatmul.mubr.bf16.gmra.mrb[20].mxu0 %v5721_v8  ;;  %4586 = vmatprep.mubr.bf16.mxu1 %v5697_v55  ;;  %v4104_v55 = vld [vmem:[%s5500_s30 + $0x198] sm:$0xff]  ;;  %v4105_v8 = vld [vmem:[%s5500_s30 + $0x1a0] sm:$0xff] }
  0xba   : > { %4794 = vmatprep.mubr.bf16.mxu0 %v5725_v10  ;;  %4615 = vmatpush3.bf16.msra.mxu1 %v5273_v32  ;;  %v4130_v10 = vld [vmem:[%s5500_s30 + $0x31] sm:$0xff]  ;;  %v2481_v49 = vpack.c.bf16 %v4105_v8, %v4104_v55  ;;  %v3918_v32 = vld [vmem:[%s5500_s30 + $0xa8] sm:$0xff]  ;;  %v6021_v8 = vpack.c.bf16 %v4159_v38, %v4158_v37 }
  0xbb   : > { %4616 = vmatprep.subr.bf16.mxu1 %v5275_v20 }
  0xbe   : > { %4617 = vmatpush3.bf16.msra.mxu1 %v5275_v20  ;;  %v3919_v20 = vld [vmem:[%s5500_s30 + $0xb0] sm:$0xff] }
  0xbf   : > { %4618 = vmatprep.subr.bf16.mxu1 %v5277_v54  ;;  %v1361_v55 = vpack.c.bf16 %v3919_v20, %v3918_v32  ;;  %v1368_v32 = vpack.c.bf16 %v3933_v17, %v3932_v59 }
  0xc0   : > { %4587 = vmatmul.mubr.bf16.gmra.mrb[8].mxu1 %v5701_v57  ;;  %v5281_v57 = vld [vmem:[%s6231_s1 + $0xf0] sm:$0xff]  }
  0xc1   : > { %4795 = vmatmul.mubr.bf16.gmra.mrb[24].mxu0 %v5747_v27  ;;  %4590 = vmatprep.mubr.bf16.mxu1 %v5723_v9  ;;  %v2836_v27 = vpack.c.bf16 %v4131_v5, %v4130_v10  ;;  %v5283_v9 = vld [vmem:[%s6231_s1 + $0xf8] sm:$0xff]   ;;  %v5293_v10 = vld [vmem:[%s6231_s1 + $0x120] sm:$0xff]  }
  0xc2   : > { %4798 = vmatprep.mubr.bf16.mxu0 %v5927_v56  ;;  %4619 = vmatpush3.bf16.msra.mxu1 %v5277_v54  ;;  %v5292_v54 = vld [vmem:[%s6231_s1 + $0x118] sm:$0xff]   ;;  %v3920_v5 = vld [vmem:[%s5500_s30 + $0xc0] sm:$0xff] }
  0xc3   : > { %4620 = vmatprep.subr.bf16.mxu1 %v5279_v39 }
  0xc6   : > { %4621 = vmatpush3.bf16.msra.mxu1 %v5279_v39 }
  0xc7   : > { %4622 = vmatprep.subr.bf16.mxu1 %v5281_v57 }
  0xc8   : > { %4591 = vmatmul.mubr.bf16.gmra.mrb[12].mxu1 %v5727_v11  ;;  %v5280_v11 = vld [vmem:[%s6231_s1 + $0x208] sm:$0xff]  }
  0xc9   : > { %4799 = vmatmul.mubr.bf16.gmra.mrb[28].mxu0 %v2481_v49  ;;  %4594 = vmatprep.mubr.bf16.mxu1 %v5749_v28  ;;  %v5289_v28 = vld [vmem:[%s6231_s1 + $0x100] sm:$0xff]  }
  0xca   : > { %4818 = vmatprep.mubr.bf16.mxu0 %v2836_v27  ;;  %4623 = vmatpush3.bf16.msra.mxu1 %v5281_v57  ;;  %v3921_v57 = vld [vmem:[%s5500_s30 + $0xc8] sm:$0xff]  ;;  %v4160_v49 = vld [vmem:[%s5500_s30 + $0x199] sm:$0xff] }
  0xcb   : > { %4624 = vmatprep.subr.bf16.mxu1 %v5283_v9  ;;  %v4161_v27 = vld [vmem:[%s5500_s30 + $0x1a1] sm:$0xff] }
  0xce   : > { %4625 = vmatpush3.bf16.msra.mxu1 %v5283_v9  ;;  %v3922_v9 = vld [vmem:[%s5500_s30 + $0xd8] sm:$0xff] }
  0xcf   : > { %4898 = vmatprep.subr.bf16.mxu1 %v5289_v28 }
  0xd0   : > { %4595 = vmatmul.mubr.bf16.gmra.mrb[16].mxu1 %v5751_v30  ;;  %v5284_v30 = vld [vmem:[%s6231_s1 + $0x218] sm:$0xff]  }
  0xd1   : > { %4819 = vmatmul.mubr.bf16.vlgmr.msra.gmra.mrb[0].mxu0 %v2837_v52  ;;  %4598 = vmatprep.mubr.bf16.mxu1 %v5768_v45  ;;  %v4142_v45 = vld [vmem:[%s5500_s30 + $0xc1] sm:$0xff]  ;;  %v1362_v52 = vpack.c.bf16 %v3921_v57, %v3920_v5 }
  0xd2   : > { %4851 = vmatpush3.bf16.msra.mxu0 %v5278_v19  ;;  %4822 = vmatprep.mubr.bf16.mxu0 %v2838_v1  ;;  %v2842_v40 = vpack.c.bf16 %v4143_v29, %v4142_v45  ;;  %v3916_v19 = vld [vmem:[%s5500_s30 + $0x90] sm:$0xff]  ;;  %v2851_v1 = vpack.c.bf16 %v4161_v27, %v4160_v49  ;;  %v5296_v29 = vld [vmem:[%s6231_s1 + $0x138] sm:$0xff]  }
  0xd3   : > { %4852 = vmatprep.subr.bf16.mxu0 %v5280_v11  ;;  %v1360_v39 = vpack.c.bf16 %v3917_v4, %v3916_v19  ;;  %v4191_v45 = vld [vmem:[%s5500_s30 + $0x6a] sm:$0xff]  ;;  %v4198_v19 = vld [vmem:[%s5500_s30 + $0xc2] sm:$0xff]  ;;  %v4205_v27 = vld [vmem:[%s5500_s30 + $0x112] sm:$0xff] }
  0xd4   : > { %v4199_v4 = vld [vmem:[%s5500_s30 + $0xca] sm:$0xff] }
  0xd5   : > { %v3212_v38 = vpack.c.bf16 %v4199_v4, %v4198_v19  ;;  %v4204_v49 = vld [vmem:[%s5500_s30 + $0x10a] sm:$0xff] }
  0xd6   : > { %4853 = vmatpush3.bf16.msra.mxu0 %v5280_v11  ;;  %v1363_v11 = vpack.c.bf16 %v3923_v7, %v3922_v9  ;;  %v4206_v9 = vld [vmem:[%s5500_s30 + $0x122] sm:$0xff]  ;;  %v4207_v7 = vld [vmem:[%s5500_s30 + $0x12a] sm:$0xff] }
  0xd7   : > { %4854 = vmatprep.subr.bf16.mxu0 %v5282_v35 }
  0xd8   : > { %4599 = vmatmul.mubr.bf16.gmra.mrb[20].mxu1 %v5770_v46  ;;  %v5286_v46 = vld [vmem:[%s6231_s1 + $0x228] sm:$0xff]  }
  0xd9   : > { %4823 = vmatmul.mubr.bf16.gmra.mrb[4].mxu0 %v2839_v25  ;;  %4602 = vmatprep.mubr.bf16.mxu1 %v5788_v60  ;;  %v3906_v60 = vld [vmem:[%s5500_s30 + $0x18] sm:$0xff]  ;;  %v3926_v25 = vld [vmem:[%s5500_s30 + $0x108] sm:$0xff] }
  0xda   : > { %4826 = vmatprep.mubr.bf16.mxu0 %v2840_v26  ;;  %4855 = vmatpush3.bf16.msra.mxu0 %v5282_v35  ;;  %v1355_v43 = vpack.c.bf16 %v3907_v42, %v3906_v60  ;;  %v4189_v35 = vld [vmem:[%s5500_s30 + $0x52] sm:$0xff]  ;;  %v3928_v42 = vld [vmem:[%s5500_s30 + $0x120] sm:$0xff] }
  0xdb   : > { %4856 = vmatprep.subr.bf16.mxu0 %v5284_v30  ;;  %v3927_v26 = vld [vmem:[%s5500_s30 + $0x110] sm:$0xff] }
  0xde   : > { %4857 = vmatpush3.bf16.msra.mxu0 %v5284_v30  ;;  %v4190_v30 = vld [vmem:[%s5500_s30 + $0x62] sm:$0xff] }
  0xdf   : > { %4858 = vmatprep.subr.bf16.mxu0 %v5285_v31  ;;  %v3208_v60 = vpack.c.bf16 %v4191_v45, %v4190_v30 }
  0xe0   : > { %4603 = vmatmul.mubr.bf16.gmra.mrb[24].mxu1 %v5790_v34  ;;  %v3908_v34 = vld [vmem:[%s5500_s30 + $0x30] sm:$0xff] }
  0xe1   : > { %4827 = vmatmul.mubr.bf16.gmra.mrb[8].mxu0 %v5608_v3  ;;  %4606 = vmatprep.mubr.bf16.mxu1 %v5806_v6  ;;  %v5288_v3 = vld [vmem:[%s6231_s1 + $0x238] sm:$0xff]  }
  0xe2   : > { %4830 = vmatprep.mubr.bf16.mxu0 %v2842_v40  ;;  %4859 = vmatpush3.bf16.msra.mxu0 %v5285_v31  ;;  %v3909_v6 = vld [vmem:[%s5500_s30 + $0x38] sm:$0xff]  ;;  %v1364_v31 = vpack.c.bf16 %v3925_v22, %v3924_v21  ;;  %v3207_v40 = vpack.c.bf16 %v4189_v35, %v4188_v23  ;;  %v4215_v21 = vld [vmem:[%s5500_s30 + $0x18a] sm:$0xff]  ;;  %v4217_v35 = vld [vmem:[%s5500_s30 + $0x1a2] sm:$0xff] }
  0xe3   : > { %4860 = vmatprep.subr.bf16.mxu0 %v5286_v46  ;;  %v1356_v51 = vpack.c.bf16 %v3909_v6, %v3908_v34  ;;  %v3930_v34 = vld [vmem:[%s5500_s30 + $0x138] sm:$0xff]  ;;  %v3931_v6 = vld [vmem:[%s5500_s30 + $0x140] sm:$0xff] }
  0xe4   : > { %v4216_v23 = vld [vmem:[%s5500_s30 + $0x19a] sm:$0xff] }
  0xe6   : > { %4861 = vmatpush3.bf16.msra.mxu0 %v5286_v46  ;;  %v1365_v46 = vpack.c.bf16 %v3927_v26, %v3926_v25  ;;  %v3221_v25 = vpack.c.bf16 %v4217_v35, %v4216_v23 }
  0xe7   : > { %4862 = vmatprep.subr.bf16.mxu0 %v5287_v50 }
  0xe8   : > { %4607 = vmatmul.mubr.bf16.gmra.mrb[28].mxu1 %v5808_v36  ;;  %v3912_v36 = vld [vmem:[%s5500_s30 + $0x60] sm:$0xff] }
  0xe9   : > { %4831 = vmatmul.mubr.bf16.gmra.mrb[12].mxu0 %v5837_v24  ;;  %4626 = vmatprep.mubr.bf16.mxu1 %v1355_v43  ;;  %v1358_v61 = vpack.c.bf16 %v3913_v58, %v3912_v36  ;;  %v4192_v43 = vld [vmem:[%s5500_s30 + $0x7a] sm:$0xff]  ;;  %v1367_v36 = vpack.c.bf16 %v3931_v6, %v3930_v34  ;;  %v3210_v58 = vpack.c.bf16 %v4195_v47, %v4194_v44 }
  0xea   : > { %4834 = vmatprep.mubr.bf16.mxu0 %v5839_v18  ;;  %4863 = vmatpush3.bf16.msra.mxu0 %v5287_v50  ;;  %v3929_v50 = vld [vmem:[%s5500_s30 + $0x128] sm:$0xff] }
  0xeb   : > { %4864 = vmatprep.subr.bf16.mxu0 %v5288_v3 }
  0xee   : > { %4865 = vmatpush3.bf16.msra.mxu0 %v5288_v3  ;;  %v4193_v3 = vld [vmem:[%s5500_s30 + $0x82] sm:$0xff] }
  0xf0   : > { %4627 = vmatmul.mubr.bf16.vlgmr.msra.gmra.mrb[0].mxu1 %v1356_v51  ;;  %v1366_v51 = vpack.c.bf16 %v3929_v50, %v3928_v42 }
  0xf1   : > { %4835 = vmatmul.mubr.bf16.gmra.mrb[16].mxu0 %v5857_v48  ;;  %4906 = vmatpush3.bf16.msra.mxu1 %v5289_v28  ;;  %v3206_v28 = vpack.c.bf16 %v4187_v13, %v4186_v12  ;;  %v3215_v12 = vpack.c.bf16 %v4205_v27, %v4204_v49  ;;  %v3216_v13 = vpack.c.bf16 %v4207_v7, %v4206_v9 }
  0xf2   : > { %4630 = vmatprep.mubr.bf16.mxu1 %v1357_v2  ;;  %4838 = vmatprep.mubr.bf16.mxu0 %v5859_v41  ;;  %v3209_v2 = vpack.c.bf16 %v4193_v3, %v4192_v43 }
  0xf3   : > { %4899 = vmatprep.subr.bf16.mxu1 %v5290_v33 }
  0xf5   : > { %4907 = vmatpush3.bf16.msra.mxu1 %v5290_v33  ;;  %v4196_v33 = vld [vmem:[%s5500_s30 + $0xaa] sm:$0xff] }
  0xf6   : > { %4900 = vmatprep.subr.bf16.mxu1 %v5291_v15 }
  0xf8   : > { %4631 = vmatmul.mubr.bf16.gmra.mrb[4].mxu1 %v1358_v61  ;;  %v4197_v61 = vld [vmem:[%s5500_s30 + $0xb2] sm:$0xff] }
  0xf9   : > { %4839 = vmatmul.mubr.bf16.gmra.mrb[20].mxu0 %v5875_v53  ;;  %4634 = vmatprep.mubr.bf16.mxu1 %v1359_v0  ;;  %v3934_v0 = vld [vmem:[%s5500_s30 + $0x168] sm:$0xff]  ;;  %v3211_v20 = vpack.c.bf16 %v4197_v61, %v4196_v33 }
  0xfa   : > { %4842 = vmatprep.mubr.bf16.mxu0 %v5877_v63  ;;  %4908 = vmatpush3.bf16.msra.mxu1 %v5291_v15  ;;  %v3935_v15 = vld [vmem:[%s5500_s30 + $0x170] sm:$0xff] }
  0xfb   : > { %4901 = vmatprep.subr.bf16.mxu1 %v5292_v54  ;;  %v1369_v37 = vpack.c.bf16 %v3935_v15, %v3934_v0 }
  0xfe   : > { %4909 = vmatpush3.bf16.msra.mxu1 %v5292_v54  ;;  %v4200_v54 = vld [vmem:[%s5500_s30 + $0xda] sm:$0xff] }
  0xff   : > { %4902 = vmatprep.subr.bf16.mxu1 %v5293_v10 }
 0x100   : > { %4635 = vmatmul.mubr.bf16.gmra.mrb[8].mxu1 %v1360_v39  ;;  %v4201_v39 = vld [vmem:[%s5500_s30 + $0xe2] sm:$0xff] }
 0x101   : > { %4843 = vmatmul.mubr.bf16.gmra.mrb[24].mxu0 %v5893_v62  ;;  %4638 = vmatprep.mubr.bf16.mxu1 %v1361_v55  ;;  %v4202_v55 = vld [vmem:[%s5500_s30 + $0xf2] sm:$0xff]  ;;  %v3213_v5 = vpack.c.bf16 %v4201_v39, %v4200_v54 }
 0x102   : > { %4846 = vmatprep.mubr.bf16.mxu0 %v6021_v8  ;;  %4910 = vmatpush3.bf16.msra.mxu1 %v5293_v10  ;;  %v4203_v10 = vld [vmem:[%s5500_s30 + $0xfa] sm:$0xff] }
 0x103   : > { %4903 = vmatprep.subr.bf16.mxu1 %v5294_v14  ;;  %v3214_v57 = vpack.c.bf16 %v4203_v10, %v4202_v55 }
 0x106   : > { %4911 = vmatpush3.bf16.msra.mxu1 %v5294_v14  ;;  %v4209_v14 = vld [vmem:[%s5500_s30 + $0x142] sm:$0xff] }
 0x107   : > { %4904 = vmatprep.subr.bf16.mxu1 %v5295_v16 }
 0x108   : > { %4639 = vmatmul.mubr.bf16.gmra.mrb[12].mxu1 %v1362_v52  ;;  %v4211_v52 = vld [vmem:[%s5500_s30 + $0x15a] sm:$0xff] }
 0x109   : > { %4847 = vmatmul.mubr.bf16.gmra.mrb[28].mxu0 %v2851_v1  ;;  %4642 = vmatprep.mubr.bf16.mxu1 %v1363_v11 }
 0x10a   : > { %4866 = vmatprep.mubr.bf16.mxu0 %v3206_v28  ;;  %4912 = vmatpush3.bf16.msra.mxu1 %v5295_v16  ;;  %v4213_v28 = vld [vmem:[%s5500_s30 + $0x172] sm:$0xff]  ;;  %v4214_v16 = vld [vmem:[%s5500_s30 + $0x182] sm:$0xff] }
 0x10b   : > { %4905 = vmatprep.subr.bf16.mxu1 %v5296_v29  ;;  %v3220_v22 = vpack.c.bf16 %v4215_v21, %v4214_v16 }
 0x10e   : > { %4913 = vmatpush3.bf16.msra.mxu1 %v5296_v29 }
 0x110   : > { %4643 = vmatmul.mubr.bf16.gmra.mrb[16].mxu1 %v1364_v31 }
 0x111   : > { %4867 = vmatmul.mubr.bf16.vlgmr.msra.gmra.mrb[0].mxu0 %v3207_v40  ;;  %4646 = vmatprep.mubr.bf16.mxu1 %v1365_v46 }
 0x112   : > { %4870 = vmatprep.mubr.bf16.mxu0 %v3208_v60 }
 0x118   : > { %4647 = vmatmul.mubr.bf16.gmra.mrb[20].mxu1 %v1366_v51 }
 0x119   : > { %4871 = vmatmul.mubr.bf16.gmra.mrb[4].mxu0 %v3209_v2  ;;  %4650 = vmatprep.mubr.bf16.mxu1 %v1367_v36 }
 0x11a   : > { %4874 = vmatprep.mubr.bf16.mxu0 %v3210_v58 }
 0x120   : > { %4651 = vmatmul.mubr.bf16.gmra.mrb[24].mxu1 %v1368_v32 }
 0x121   : > { %4875 = vmatmul.mubr.bf16.gmra.mrb[8].mxu0 %v3211_v20  ;;  %4654 = vmatprep.mubr.bf16.mxu1 %v1369_v37 }
 0x122   : > { %4878 = vmatprep.mubr.bf16.mxu0 %v3212_v38 }
 0x128   : > { %4655 = vmatmul.mubr.bf16.gmra.mrb[28].mxu1 %v5927_v56  ;;  %v4208_v56 = vld [vmem:[%s5500_s30 + $0x13a] sm:$0xff] }
 0x129   : > { %4879 = vmatmul.mubr.bf16.gmra.mrb[12].mxu0 %v3213_v5  ;;  %4690 = vmatprep.mubr.bf16.mxu1 %v5837_v24  ;;  %v4210_v24 = vld [vmem:[%s5500_s30 + $0x152] sm:$0xff]  ;;  %v3217_v1 = vpack.c.bf16 %v4209_v14, %v4208_v56 }
 0x12a   : > { %4882 = vmatprep.mubr.bf16.mxu0 %v3214_v57  ;;  %v3218_v11 = vpack.c.bf16 %v4211_v52, %v4210_v24 }
 0x130   : > { %4691 = vmatmul.mubr.bf16.vlgmr.msra.gmra.mrb[16].mxu1 %v5839_v18  ;;  %v4212_v18 = vld [vmem:[%s5500_s30 + $0x16a] sm:$0xff]  ;;  %s6107_s30 = sand.u32 1, %s5383_s13  }
 0x131   : > { %4883 = vmatmul.mubr.bf16.gmra.mrb[16].mxu0 %v3215_v12  ;;  %4694 = vmatprep.mubr.bf16.mxu1 %v5857_v48  ;;  %v3219_v48 = vpack.c.bf16 %v4213_v28, %v4212_v18  ;;  %s3847_s8 = sshll.u32 %s6107_s30, 8  ;;  %s3718_s24 = scalar_lea.sflag [#allocation4], %s6107_s30 }
 0x132   : > { %4886 = vmatprep.mubr.bf16.mxu0 %v3216_v13  ;;  %s6110_s9 = scalar_lea.vmem [#allocation3], %s3847_s8 }
 0x133   : > { %s3736_s11 = sshll.u32 %s6110_s9, 4  ;;  %s6153_s11 = int_to_ptr.vmem [resolvable:$true] %s3736_s11 }
 0x134   : > { %s5297_s25 = scalar_lea.vmem %s6153_s11, 4096  ;;  %p5304_p0 = scmp.lt.s32.totalorder %s6153_s11, %s5302_s27 }
 0x135   : > { %p5298_p11 = scmp.ne.s32.totalorder %s6153_s11, %s5297_s25  ;;  %p5305_p1 = scmp.lt.s32.totalorder %s5303_s28, %s5297_s25 }
 0x137   : > { %p5299_p12 = pnand %p5298_p11, %p5455_p5  ;;  %p5306_p2 = por %p5305_p1, %p5304_p0 }
 0x138   : > { %4695 = vmatmul.mubr.bf16.gmra.mrb[20].mxu1 %v5859_v41 }
 0x139   : > { %4887 = vmatmul.mubr.bf16.gmra.mrb[20].mxu0 %v3217_v1  ;;  %4698 = vmatprep.mubr.bf16.mxu1 %v5875_v53  ;;  %p5300_p13 = pneg %p5299_p12 }
 0x13a   : > { %4890 = vmatprep.mubr.bf16.mxu0 %v3218_v11 }
 0x13b   : > { %p5307_p3 = pnand %p5306_p2, %p5300_p13 }
 0x140   : > { %4699 = vmatmul.mubr.bf16.gmra.mrb[24].mxu1 %v5877_v63 }
 0x141   : > { %4891 = vmatmul.mubr.bf16.gmra.mrb[24].mxu0 %v3219_v48  ;;  %4702 = vmatprep.mubr.bf16.mxu1 %v5893_v62 }
 0x142   : > { %4894 = vmatprep.mubr.bf16.mxu0 %v3220_v22 }
 0x148   : > { %4703 = vmatmul.mubr.bf16.gmra.mrb[28].mxu1 %v6021_v8 }
 0x149   : > { %4895 = vmatmul.mubr.bf16.gmra.mrb[28].mxu0 %v3221_v25 }
 0x1c3   : > { %v4628_v41 = vpop.f32.mrb[0].mxu1 }
 0x1c4   : > { %v1502_v53 = vpop.f32.mrb[1].mxu1 }
 0x1c5   : > { %v4629_v26 = vpop.f32.mrb[2].mxu1 }
 0x1c6   : > { %v1505_v30 = vpop.f32.mrb[3].mxu1 }
 0x1cb   : > { %v4632_v45 = vpop.f32.mrb[4].mxu1 }
 0x1cc   : > { %v1518_v29 = vpop.f32.mrb[5].mxu1 }
 0x1cd   : > { %v4633_v31 = vpop.f32.mrb[6].mxu1 }
 0x1ce   : > { %v1521_v40 = vpop.f32.mrb[7].mxu1 }
 0x1d3   : > { %v4636_v63 = vpop.f32.mrb[8].mxu1 }
 0x1d4   : > { %v1534_v46 = vpop.f32.mrb[9].mxu1 }
 0x1d5   : > { %v4637_v60 = vpop.f32.mrb[10].mxu1 }
 0x1d6   : > { %v6096_v62 = vpop.f32.mrb[11].mxu1 }
 0x1db   : > { %v6098_v42 = vpop.f32.mrb[12].mxu1 }
 0x1dc   : > { %v6100_v50 = vpop.f32.mrb[13].mxu1 }
 0x1dd   : > { %v6102_v8 = vpop.f32.mrb[14].mxu1 }
 0x1de   : > { %v6104_v43 = vpop.f32.mrb[15].mxu1 }
 0x1e4   : > { %v4868_v3 = vpop.f32.mrb[0].mxu0 }
 0x1e5   : > { %v4914_v34 = vadd.f32 %v4868_v3, %v4628_v41  ;;  %v3353_v6 = vpop.f32.mrb[1].mxu0 }
 0x1e6   : > { %v4915_v44 = vadd.f32 %v3353_v6, %v1502_v53  ;;  %v4869_v47 = vpop.f32.mrb[2].mxu0 }
 0x1e7   : > { %3578 = vst [vmem:[%s6110_s9 + $0x10] sm:$0xff] %v4914_v34  ;;  %v4916_v51 = vadd.f32 %v4869_v47, %v4629_v26  ;;  %v3356_v2 = vpop.f32.mrb[3].mxu0  ;;  %v3647_v33 = vmul.f32 %v4914_v34, %v4914_v34 }
 0x1e8   : > { %3576 = vst [vmem:[%s6110_s9] sm:$0xff] %v4915_v44  ;;  %v4917_v36 = vadd.f32 %v3356_v2, %v1505_v30  ;;  %v3645_v58 = vmul.f32 %v4915_v44, %v4915_v44 }
 0x1e9   : > { %3579 = vst [vmem:[%s6110_s9 + $0x18] sm:$0xff] %v4916_v51  ;;  %v3648_v32 = vmul.f32 %v4916_v51, %v4916_v51 }
 0x1ea   : > { %3577 = vst [vmem:[%s6110_s9 + $0x8] sm:$0xff] %v4917_v36  ;;  %v3608_v59 = vadd.f32 %v4917_v36, %v4915_v44  ;;  %v3646_v17 = vmul.f32 %v4917_v36, %v4917_v36 }
 0x1ec   : > { %v3609_v61 = vadd.f32 %v4914_v34, %v3608_v59  ;;  %v3677_v0 = vadd.f32 %v3646_v17, %v3645_v58  ;;  %v4872_v15 = vpop.f32.mrb[4].mxu0 }
 0x1ed   : > { %v4918_v19 = vadd.f32 %v4872_v15, %v4632_v45  ;;  %v3369_v4 = vpop.f32.mrb[5].mxu0 }
 0x1ee   : > { %v3678_v20 = vadd.f32 %v3677_v0, %v3647_v33  ;;  %v4919_v37 = vadd.f32 %v3369_v4, %v1518_v29  ;;  %v3610_v38 = vadd.f32 %v4916_v51, %v3609_v61  ;;  %v4873_v54 = vpop.f32.mrb[6].mxu0 }
 0x1ef   : > { %3582 = vst [vmem:[%s6110_s9 + $0x30] sm:$0xff] %v4918_v19  ;;  %v4920_v39 = vadd.f32 %v4873_v54, %v4633_v31  ;;  %v3372_v55 = vpop.f32.mrb[7].mxu0  ;;  %v3651_v12 = vmul.f32 %v4918_v19, %v4918_v19 }
 0x1f0   : > { %3580 = vst [vmem:[%s6110_s9 + $0x20] sm:$0xff] %v4919_v37  ;;  %v3611_v10 = vadd.f32 %v4919_v37, %v3610_v38  ;;  %v3649_v5 = vmul.f32 %v4919_v37, %v4919_v37  ;;  %v3679_v57 = vadd.f32 %v3678_v20, %v3648_v32  ;;  %v4921_v49 = vadd.f32 %v3372_v55, %v1521_v40 }
 0x1f1   : > { %3583 = vst [vmem:[%s6110_s9 + $0x38] sm:$0xff] %v4920_v39  ;;  %v3652_v1 = vmul.f32 %v4920_v39, %v4920_v39 }
 0x1f2   : > { %v3680_v27 = vadd.f32 %v3679_v57, %v3649_v5  ;;  %3581 = vst [vmem:[%s6110_s9 + $0x28] sm:$0xff] %v4921_v49  ;;  %v3612_v9 = vadd.f32 %v4921_v49, %v3611_v10  ;;  %v3650_v7 = vmul.f32 %v4921_v49, %v4921_v49 }
 0x1f4   : > { %v3613_v13 = vadd.f32 %v4918_v19, %v3612_v9  ;;  %v3681_v56 = vadd.f32 %v3680_v27, %v3650_v7  ;;  %v4876_v14 = vpop.f32.mrb[8].mxu0 }
 0x1f5   : > { %v4922_v24 = vadd.f32 %v4876_v14, %v4636_v63  ;;  %v3385_v52 = vpop.f32.mrb[9].mxu0 }
 0x1f6   : > { %v3682_v11 = vadd.f32 %v3681_v56, %v3651_v12  ;;  %v4923_v18 = vadd.f32 %v3385_v52, %v1534_v46  ;;  %v3614_v28 = vadd.f32 %v4920_v39, %v3613_v13  ;;  %v4877_v16 = vpop.f32.mrb[10].mxu0 }
 0x1f7   : > { %3586 = vst [vmem:[%s6110_s9 + $0x50] sm:$0xff] %v4922_v24  ;;  %v4924_v21 = vadd.f32 %v4877_v16, %v4637_v60  ;;  %v3388_v48 = vpop.f32.mrb[11].mxu0  ;;  %v3655_v30 = vmul.f32 %v4922_v24, %v4922_v24 }
 0x1f8   : > { %3584 = vst [vmem:[%s6110_s9 + $0x40] sm:$0xff] %v4923_v18  ;;  %v3615_v22 = vadd.f32 %v4923_v18, %v3614_v28  ;;  %v3653_v23 = vmul.f32 %v4923_v18, %v4923_v18  ;;  %v3683_v35 = vadd.f32 %v3682_v11, %v3652_v1  ;;  %v4925_v25 = vadd.f32 %v3388_v48, %v6096_v62 }
 0x1f9   : > { %3587 = vst [vmem:[%s6110_s9 + $0x58] sm:$0xff] %v4924_v21  ;;  %v3656_v46 = vmul.f32 %v4924_v21, %v4924_v21 }
 0x1fa   : > { %v3684_v41 = vadd.f32 %v3683_v35, %v3653_v23  ;;  %3585 = vst [vmem:[%s6110_s9 + $0x48] sm:$0xff] %v4925_v25  ;;  %v3616_v53 = vadd.f32 %v4925_v25, %v3615_v22  ;;  %v3654_v26 = vmul.f32 %v4925_v25, %v4925_v25 }
 0x1fc   : > { %v3617_v45 = vadd.f32 %v4922_v24, %v3616_v53  ;;  %v3685_v29 = vadd.f32 %v3684_v41, %v3654_v26  ;;  %v4880_v31 = vpop.f32.mrb[12].mxu0 }
 0x1fd   : > { %v4926_v40 = vadd.f32 %v4880_v31, %v6098_v42  ;;  %v3401_v63 = vpop.f32.mrb[13].mxu0 }
 0x1fe   : > { %v3686_v60 = vadd.f32 %v3685_v29, %v3655_v30  ;;  %v4927_v62 = vadd.f32 %v3401_v63, %v6100_v50  ;;  %v3618_v3 = vadd.f32 %v4924_v21, %v3617_v45  ;;  %v4881_v34 = vpop.f32.mrb[14].mxu0 }
 0x1ff   : > { %3590 = vst [vmem:[%s6110_s9 + $0x70] sm:$0xff] %v4926_v40  ;;  %v4928_v6 = vadd.f32 %v4881_v34, %v6102_v8  ;;  %v3404_v44 = vpop.f32.mrb[15].mxu0  ;;  %v3659_v50 = vmul.f32 %v4926_v40, %v4926_v40 }
 0x200   : > { %3588 = vst [vmem:[%s6110_s9 + $0x60] sm:$0xff] %v4927_v62  ;;  %v3619_v47 = vadd.f32 %v4927_v62, %v3618_v3  ;;  %v3657_v51 = vmul.f32 %v4927_v62, %v4927_v62  ;;  %v3687_v2 = vadd.f32 %v3686_v60, %v3656_v46  ;;  %v4929_v36 = vadd.f32 %v3404_v44, %v6104_v43 }
 0x201   : > { %3591 = vst [vmem:[%s6110_s9 + $0x78] sm:$0xff] %v4928_v6  ;;  %v3660_v32 = vmul.f32 %v4928_v6, %v4928_v6 }
 0x202   : > { %v3688_v42 = vadd.f32 %v3687_v2, %v3657_v51  ;;  %3589 = vst [vmem:[%s6110_s9 + $0x68] sm:$0xff] %v4929_v36  ;;  %v3620_v58 = vadd.f32 %v4929_v36, %v3619_v47  ;;  %v3658_v59 = vmul.f32 %v4929_v36, %v4929_v36 }
 0x203   : > { %v4692_v17 = vpop.f32.mrb[16].mxu1 }
 0x204   : > { %v3621_v33 = vadd.f32 %v4926_v40, %v3620_v58  ;;  %v3689_v61 = vadd.f32 %v3688_v42, %v3658_v59  ;;  %v4884_v0 = vpop.f32.mrb[16].mxu0  ;;  %v1936_v8 = vpop.f32.mrb[17].mxu1 }
 0x205   : > { %v4930_v15 = vadd.f32 %v4884_v0, %v4692_v17  ;;  %v3417_v19 = vpop.f32.mrb[17].mxu0  ;;  %v4693_v4 = vpop.f32.mrb[18].mxu1 }
 0x206   : > { %v3690_v43 = vadd.f32 %v3689_v61, %v3659_v50  ;;  %v4931_v20 = vadd.f32 %v3417_v19, %v1936_v8  ;;  %v3622_v37 = vadd.f32 %v4928_v6, %v3621_v33  ;;  %v4885_v38 = vpop.f32.mrb[18].mxu0  ;;  %v1939_v54 = vpop.f32.mrb[19].mxu1 }
 0x207   : > { %3594 = vst [vmem:[%s6110_s9 + $0x90] sm:$0xff] %v4930_v15  ;;  %v4932_v39 = vadd.f32 %v4885_v38, %v4693_v4  ;;  %v3420_v55 = vpop.f32.mrb[19].mxu0  ;;  %v3663_v13 = vmul.f32 %v4930_v15, %v4930_v15 }
 0x208   : > { %3592 = vst [vmem:[%s6110_s9 + $0x80] sm:$0xff] %v4931_v20  ;;  %v3623_v10 = vadd.f32 %v4931_v20, %v3622_v37  ;;  %v3661_v5 = vmul.f32 %v4931_v20, %v4931_v20  ;;  %v3691_v57 = vadd.f32 %v3690_v43, %v3660_v32  ;;  %v4933_v49 = vadd.f32 %v3420_v55, %v1939_v54 }
 0x209   : > { %3595 = vst [vmem:[%s6110_s9 + $0x98] sm:$0xff] %v4932_v39  ;;  %v3664_v28 = vmul.f32 %v4932_v39, %v4932_v39 }
 0x20a   : > { %v3692_v27 = vadd.f32 %v3691_v57, %v3661_v5  ;;  %3593 = vst [vmem:[%s6110_s9 + $0x88] sm:$0xff] %v4933_v49  ;;  %v3624_v9 = vadd.f32 %v4933_v49, %v3623_v10  ;;  %v3662_v7 = vmul.f32 %v4933_v49, %v4933_v49 }
 0x20b   : > { %v4696_v12 = vpop.f32.mrb[20].mxu1 }
 0x20c   : > { %v3625_v56 = vadd.f32 %v4930_v15, %v3624_v9  ;;  %v3693_v14 = vadd.f32 %v3692_v27, %v3662_v7  ;;  %v4888_v24 = vpop.f32.mrb[20].mxu0  ;;  %v1952_v52 = vpop.f32.mrb[21].mxu1 }
 0x20d   : > { %v4934_v1 = vadd.f32 %v4888_v24, %v4696_v12  ;;  %v3433_v11 = vpop.f32.mrb[21].mxu0  ;;  %v4697_v18 = vpop.f32.mrb[22].mxu1 }
 0x20e   : > { %v3694_v16 = vadd.f32 %v3693_v14, %v3663_v13  ;;  %v4935_v21 = vadd.f32 %v3433_v11, %v1952_v52  ;;  %v3626_v48 = vadd.f32 %v4932_v39, %v3625_v56  ;;  %v4889_v22 = vpop.f32.mrb[22].mxu0  ;;  %v1955_v23 = vpop.f32.mrb[23].mxu1 }
 0x20f   : > { %3598 = vst [vmem:[%s6110_s9 + $0xb0] sm:$0xff] %v4934_v1  ;;  %v4936_v35 = vadd.f32 %v4889_v22, %v4697_v18  ;;  %v3436_v25 = vpop.f32.mrb[23].mxu0  ;;  %v3667_v63 = vmul.f32 %v4934_v1, %v4934_v1 }
 0x210   : > { %3596 = vst [vmem:[%s6110_s9 + $0xa0] sm:$0xff] %v4935_v21  ;;  %v3627_v41 = vadd.f32 %v4935_v21, %v3626_v48  ;;  %v3665_v53 = vmul.f32 %v4935_v21, %v4935_v21  ;;  %v3695_v26 = vadd.f32 %v3694_v16, %v3664_v28  ;;  %v4937_v30 = vadd.f32 %v3436_v25, %v1955_v23 }
 0x211   : > { %3599 = vst [vmem:[%s6110_s9 + $0xb8] sm:$0xff] %v4936_v35  ;;  %v3668_v47 = vmul.f32 %v4936_v35, %v4936_v35 }
 0x212   : > { %v3696_v45 = vadd.f32 %v3695_v26, %v3665_v53  ;;  %3597 = vst [vmem:[%s6110_s9 + $0xa8] sm:$0xff] %v4937_v30  ;;  %v3628_v29 = vadd.f32 %v4937_v30, %v3627_v41  ;;  %v3666_v31 = vmul.f32 %v4937_v30, %v4937_v30 }
 0x213   : > { %v4700_v40 = vpop.f32.mrb[24].mxu1 }
 0x214   : > { %v3629_v46 = vadd.f32 %v4934_v1, %v3628_v29  ;;  %v3697_v60 = vadd.f32 %v3696_v45, %v3666_v31  ;;  %v4892_v62 = vpop.f32.mrb[24].mxu0  ;;  %v1968_v3 = vpop.f32.mrb[25].mxu1 }
 0x215   : > { %v4938_v34 = vadd.f32 %v4892_v62, %v4700_v40  ;;  %v3449_v6 = vpop.f32.mrb[25].mxu0  ;;  %v4701_v44 = vpop.f32.mrb[26].mxu1 }
 0x216   : > { %v3698_v51 = vadd.f32 %v3697_v60, %v3667_v63  ;;  %v4939_v2 = vadd.f32 %v3449_v6, %v1968_v3  ;;  %v3630_v36 = vadd.f32 %v4936_v35, %v3629_v46  ;;  %v4893_v42 = vpop.f32.mrb[26].mxu0  ;;  %v1971_v58 = vpop.f32.mrb[27].mxu1 }
 0x217   : > { %3602 = vst [vmem:[%s6110_s9 + $0xd0] sm:$0xff] %v4938_v34  ;;  %v4940_v59 = vadd.f32 %v4893_v42, %v4701_v44  ;;  %v3452_v17 = vpop.f32.mrb[27].mxu0  ;;  %v3671_v32 = vmul.f32 %v4938_v34, %v4938_v34 }
 0x218   : > { %3600 = vst [vmem:[%s6110_s9 + $0xc0] sm:$0xff] %v4939_v2  ;;  %v3631_v50 = vadd.f32 %v4939_v2, %v3630_v36  ;;  %v3669_v33 = vmul.f32 %v4939_v2, %v4939_v2  ;;  %v3699_v61 = vadd.f32 %v3698_v51, %v3668_v47  ;;  %v4941_v0 = vadd.f32 %v3452_v17, %v1971_v58 }
 0x219   : > { %3603 = vst [vmem:[%s6110_s9 + $0xd8] sm:$0xff] %v4940_v59  ;;  %v3672_v10 = vmul.f32 %v4940_v59, %v4940_v59 }
 0x21a   : > { %v3700_v8 = vadd.f32 %v3699_v61, %v3669_v33  ;;  %3601 = vst [vmem:[%s6110_s9 + $0xc8] sm:$0xff] %v4941_v0  ;;  %v3632_v15 = vadd.f32 %v4941_v0, %v3631_v50  ;;  %v3670_v19 = vmul.f32 %v4941_v0, %v4941_v0 }
 0x21b   : > { %v4704_v4 = vpop.f32.mrb[28].mxu1 }
 0x21c   : > { %v3633_v43 = vadd.f32 %v4938_v34, %v3632_v15  ;;  %v3701_v20 = vadd.f32 %v3700_v8, %v3670_v19  ;;  %v4896_v37 = vpop.f32.mrb[28].mxu0  ;;  %v1984_v38 = vpop.f32.mrb[29].mxu1 }
 0x21d   : > { %v4942_v54 = vadd.f32 %v4896_v37, %v4704_v4  ;;  %v3465_v39 = vpop.f32.mrb[29].mxu0  ;;  %v4705_v55 = vpop.f32.mrb[30].mxu1 }
 0x21e   : > { %v3702_v5 = vadd.f32 %v3701_v20, %v3671_v32  ;;  %v4943_v57 = vadd.f32 %v3465_v39, %v1984_v38  ;;  %v3634_v49 = vadd.f32 %v4940_v59, %v3633_v43  ;;  %v4897_v27 = vpop.f32.mrb[30].mxu0  ;;  %v1987_v9 = vpop.f32.mrb[31].mxu1 }
 0x21f   : > { %3606 = vst [vmem:[%s6110_s9 + $0xf0] sm:$0xff] %v4942_v54  ;;  %v4944_v7 = vadd.f32 %v4897_v27, %v4705_v55  ;;  %v3468_v12 = vpop.f32.mrb[31].mxu0 }
 0x220   : > { %3604 = vst [vmem:[%s6110_s9 + $0xe0] sm:$0xff] %v4943_v57  ;;  %v3635_v13 = vadd.f32 %v4943_v57, %v3634_v49  ;;  %v3673_v56 = vmul.f32 %v4943_v57, %v4943_v57  ;;  %v3703_v14 = vadd.f32 %v3702_v5, %v3672_v10  ;;  %v4945_v24 = vadd.f32 %v3468_v12, %v1987_v9 }
 0x221   : > { %3607 = vst [vmem:[%s6110_s9 + $0xf8] sm:$0xff] %v4944_v7 }
 0x222   : > { %v3704_v52 = vadd.f32 %v3703_v14, %v3673_v56  ;;  %3605 = vst [vmem:[%s6110_s9 + $0xe8] sm:$0xff] %v4945_v24  ;;  %v3636_v1 = vadd.f32 %v4945_v24, %v3635_v13  ;;  %v3674_v11 = vmul.f32 %v4945_v24, %v4945_v24 }
 0x223   : > { %5310 = shalt.err (!%p5307_p3)
}
 0x224   : > { %s5311_s29 = scalar_lea.hbm %s6151_s20, 4096  ;;  %s5315_s6 = scalar_lea.hbm %s6232_s2, 8192 }
 0x225   : > { %p5312_p4 = scmp.ne.s32.totalorder %s6151_s20, %s5311_s29  ;;  %p5316_p9 = scmp.lt.u32.totalorder %s6151_s20, %s6232_s2 }
 0x226   : > { %p5317_p10 = scmp.lt.u32.totalorder %s5315_s6, %s5311_s29  ;;  %p5319_p12 = scmp.lt.u32.totalorder %s5311_s29, %s6151_s20 }
 0x227   : > { %p5313_p7 = pnand %p5312_p4, %p5455_p5 }
 0x228   : > { %p5318_p11 = por %p5317_p10, %p5316_p9 }
 0x229   : > { %p5314_p8 = pneg %p5313_p7 }
 0x22a   : > { %p5320_p13 = por %p5319_p12, %p5318_p11 }
 0x22c   : > { %p5321_p0 = pnand %p5320_p13, %p5314_p8 }
 0x22e   : > { %5324 = shalt.err (!%p5321_p0)
}
 0x22f   : > { %s5394_s9 = smov 128   ;;  %s5395_s10 = smov 8   ;;  %v3675_v18 = vmul.f32 %v4942_v54, %v4942_v54  ;;  %v3637_v28 = vadd.f32 %v4942_v54, %v3636_v1  ;;  %v3705_v16 = vadd.f32 %v3704_v52, %v3674_v11  ;;  %v3676_v21 = vmul.f32 %v4944_v7, %v4944_v7 }
 0x230   : > { %5171 = dma.vmem_to_hbm [thread:$0]  (%p5455_p5), %s6153_s11, 4096, %s6151_s20, %s3718_s24, %s5394_s9, %s5394_s9, %s5395_s10   ;;  %vm3714_vm0 = vcmask 1040384  }
 0x231   : > { %v3638_v48 = vadd.f32 %v4944_v7, %v3637_v28  ;;  %v3706_v22 = vadd.f32 %v3705_v16, %v3675_v18  ;;  %s3848_s17 = sshll.u32 %s6107_s30, 1  ;;  %s4246_s11 = sshll.u32 %s5438_s16, 5 }
 0x232   : > { %s174_s19 = scalar_lea.vmem [#allocation5], %s3848_s17  ;;  %s6187_s26 = scalar_lea.hbm %s6233_s3, %s4246_s11 }
 0x233   : > { %v3639_v23 = vrot.slane %v3638_v48, 4  ;;  %v3707_v35 = vadd.f32 %v3706_v22, %v3676_v21  ;;  %s3752_s20 = sshll.u32 %s174_s19, 4  ;;  %s3723_s27 = scalar_lea.sflag [#allocation6], %s6107_s30  ;;  %s6189_s20 = int_to_ptr.vmem [resolvable:$true] %s3752_s20 }
 0x234   : > { %s5325_s28 = scalar_lea.vmem %s6189_s20, 32  ;;  %s5396_s16 = smov [#allocation5]  }
 0x235   : > { %v3640_v25 = vadd.f32 %v3639_v23, %v3638_v48  ;;  %v3708_v41 = vrot.slane %v3707_v35, 4  ;;  %p5326_p1 = scmp.ne.s32.totalorder %s6189_s20, %s5325_s28  ;;  %s5329_s29 = sshll.u32 %s5396_s16, 4  ;;  %s5330_s29 = int_to_ptr.vmem [resolvable:$false] %s5329_s29 }
 0x236   : > { %s5331_s4 = scalar_lea.vmem %s5330_s29, 64  ;;  %p5332_p4 = scmp.lt.s32.totalorder %s6189_s20, %s5330_s29 }
 0x237   : > { %v3641_v53 = vrot.slane %v3640_v25, 2  ;;  %v3709_v26 = vadd.f32 %v3708_v41, %v3707_v35  ;;  %p5327_p2 = pnand %p5326_p1, %p5455_p5  ;;  %p5333_p7 = scmp.lt.s32.totalorder %s5331_s4, %s5325_s28 }
 0x239   : > { %v3642_v30 = vadd.f32 %v3641_v53, %v3640_v25  ;;  %v3710_v45 = vrot.slane %v3709_v26, 2  ;;  %p5328_p3 = pneg %p5327_p2  ;;  %p5334_p8 = por %p5333_p7, %p5332_p4 }
 0x23b   : > { %v3643_v29 = vrot.slane %v3642_v30, 1  ;;  %v3711_v31 = vadd.f32 %v3710_v45, %v3709_v26  ;;  %p5335_p9 = pnand %p5334_p8, %p5328_p3 }
 0x23d   : > { %v3712_v40 = vrot.slane %v3711_v31, 1  ;;  %v3644_v63 = vadd.f32 %v3643_v29, %v3642_v30 }
 0x23f   : > { %v3713_v46 = vadd.f32 %v3712_v40, %v3711_v31 }
 0x241   : > { %v3715_v60 = vsel %vm3714_vm0, %v3644_v63, %v3713_v46 }
 0x242   : > { %3716 = vst [vmem:[%s174_s19] sm:$0x3] %v3715_v60 }
 0x243   : > { %5338 = shalt.err (!%p5335_p9)
}
 0x244   : > { %s5339_s30 = scalar_lea.hbm %s6187_s26, 32  ;;  %s5343_s7 = scalar_lea.hbm %s6233_s3, 64 }
 0x245   : > { %p5340_p10 = scmp.ne.s32.totalorder %s6187_s26, %s5339_s30  ;;  %p5344_p13 = scmp.lt.u32.totalorder %s6187_s26, %s6233_s3 }
 0x246   : > { %p5345_p0 = scmp.lt.u32.totalorder %s5343_s7, %s5339_s30  ;;  %p5347_p2 = scmp.lt.u32.totalorder %s5339_s30, %s6187_s26 }
 0x247   : > { %p5341_p11 = pnand %p5340_p10, %p5455_p5 }
 0x248   : > { %p5346_p1 = por %p5345_p0, %p5344_p13 }
 0x249   : > { %p5342_p12 = pneg %p5341_p11 }
 0x24a   : > { %p5348_p3 = por %p5347_p2, %p5346_p1 }
 0x24c   : > { %p5349_p4 = pnand %p5348_p3, %p5342_p12 }
 0x24e   : > { %5352 = shalt.err (!%p5349_p4)
}
 0x24f   : > { %5172 = dma.vmem_to_hbm [thread:$0]  (%p5455_p5), %s6189_s20, 32, %s6187_s26, %s3723_s27  }
 0x250 PF: > { %p5182_p7 = scmp.ge.s32.totalorder %s5391_s15, 2  ;;  %s3764_s10 = sand.u32 1, %s5379_s12  }
 0x251   : > { %s3765_s17 = scalar_lea.sflag [#allocation4], %s3764_s10 }
 0x252   : > { %p5176_p8 = pnand %p5182_p7, %p5459_p6 }
 0x254   : > { %5370 = dma.done.wait (!%p5176_p8), %s3765_s17, 4096  }
 0x255   : > { %5372 = vsyncadd (!%p5176_p8), %s3765_s17, 4294963200  ;;  %s3774_s11 = scalar_lea.sflag [#allocation6], %s3764_s10 }
 0x256   : > { %5374 = dma.done.wait (!%p5176_p8), %s3774_s11, 32  }
 0x257   : > { %5376 = vsyncadd (!%p5176_p8), %s3774_s11, 4294967264  ;;  %p17_p5 = scmp.ge.s32.totalorder %s5442_s18, 4   ;;  %s6236_s12 = smov %s5383_s13 }
 0x258   : > { %s6237_s13 = smov %s5387_s14  ;;  %s6238_s14 = smov %s5453_s21 }
 0x259   : > { %s6239_s15 = smov %s5442_s18  ;;  %19 = sbr.rel (!%p17_p5) target bundleno = 5 (0x5), region = 90 }
 0x260   :  { %3779 = vsyncpa [#allocation4], 1 }
 0x261   :  { %3781 = vsyncpa [#allocation4 + $0x1], 1 }
 0x262   :  { %3782 = vsyncpa [#allocation6], 1 }
 0x263   :  { %3784 = vsyncpa [#allocation6 + $0x1], 1 }

</bundles_post_ra>
